<compile_context>
chip_gen: v7x
topology: tpu7x:2x2x1
jax: 0.10.0
libtpu: 0.0.40
codegen_flags: <defaults>
</compile_context>

<pallas_src>
import jax
import jax.numpy as jnp
import numpy as np
from jax import lax
from jax.experimental import pallas as pl
from jax.experimental.pallas import tpu as pltpu


def _round_up(n, m):
    return ((n + m - 1) // m) * m


# ----------------------------------------------------------------------------
# Fused kernel: per time-chunk -> input projection, GRU recurrence, mask gate.
# ----------------------------------------------------------------------------
def _masking_gru_kernel(x_ref, h0_ref, wih_ref, whh_ref, bcomb_ref, bhn_ref,
                        wg_ref, bg_ref, out_ref, hout_ref,
                        gi_scr, y_scr, h_scr):
    c = pl.program_id(1)                      # time-chunk index ("arbitrary")
    Tc, Bb, Hp = x_ref.shape

    @pl.when(c == 0)
    def _():
        h_scr[...] = h0_ref[...].astype(jnp.float32)

    # ---- Phase 1 (fused): input projection for the whole chunk. ------------
    # One full-occupancy (Tc*Bb, Hp) @ (Hp, 3Hp) bf16 matmul; result stays in
    # VMEM scratch -> no gi HBM round trip.
    x_bf = x_ref[...].astype(jnp.bfloat16).reshape(Tc * Bb, Hp)
    gi = jnp.dot(x_bf, wih_ref[...], preferred_element_type=jnp.float32)
    gi = gi + bcomb_ref[...]                  # b_ih with b_hh_r / b_hh_z folded in
    gi_scr[...] = gi.reshape(Tc, Bb, 3 * Hp)

    # Hoist the b_hh_n broadcast out of the time loop (no CSE of broadcasts).
    bn_b = jnp.broadcast_to(bhn_ref[...].astype(jnp.float32), (Bb, Hp))

    # ---- Phase 2: serial GRU recurrence (one fused (Hp,3Hp) dot per step). --
    h = h_scr[...]                            # (Bb, Hp) f32 carry

    def step(i, h):
        # Read W_hh at the dot site (bf16) so Mosaic streams it from VMEM.
        gh = jnp.dot(h.astype(jnp.bfloat16), whh_ref[...],
                     preferred_element_type=jnp.float32)      # (Bb, 3Hp)
        gi_t = gi_scr[i]                                       # (Bb, 3Hp)
        # Lane-aligned static slices (Hp % 128 == 0): no XLU shuffles.
        r = jax.nn.sigmoid(gi_t[:, 0:Hp] + gh[:, 0:Hp])
        z = jax.nn.sigmoid(gi_t[:, Hp:2 * Hp] + gh[:, Hp:2 * Hp])
        n = jnp.tanh(gi_t[:, 2 * Hp:3 * Hp] + r * (gh[:, 2 * Hp:3 * Hp] + bn_b))
        h = (1.0 - z) * n + z * h
        y_scr[i] = h.astype(y_scr.dtype)       # bf16 y chunk for the gate matmul
        return h

    # TODO(synk): v6e/v7x advanced path: keep W_hh resident in the MXU via
    # pltpu.matmul_push_rhs once per chunk + matmul_acc_lhs/matmul_pop per step.
    if Tc <= 8:                                # small static trip-count: unroll
        for i in range(Tc):
            h = step(i, h)
    else:                                      # bound live ranges at large Tc
        h = lax.fori_loop(0, Tc, step, h, unroll=4)

    h_scr[...] = h                             # carry to the next time chunk

    # ---- Phase 3 (fused): masking gate on the whole chunk (y still in VMEM).
    y2 = y_scr[...].reshape(Tc * Bb, Hp)
    g = jax.nn.sigmoid(
        jnp.dot(y2, wg_ref[...], preferred_element_type=jnp.float32)
        + bg_ref[...])
    x_f32 = x_ref[...].astype(jnp.float32).reshape(Tc * Bb, Hp)
    out_ref[...] = (g * x_f32).reshape(Tc, Bb, Hp).astype(out_ref.dtype)

    @pl.when(c == pl.num_programs(1) - 1)
    def _():
        hout_ref[...] = h                      # final hidden kept in f32


# ----------------------------------------------------------------------------
# Param packing: PyTorch layout -> padded, per-gate-concatenated, bf16 weights.
# ----------------------------------------------------------------------------
def pack_params(p, Hp):
    H = p["w_hh"].shape[1]
    D = p["w_ih"].shape[1]
    assert D == H, "gate Linear(D, D) on GRU output requires hidden == input"

    def pad2(w):   # (a, b) -> (Hp, Hp), zero padded
        return jnp.pad(w, ((0, Hp - w.shape[0]), (0, Hp - w.shape[1])))

    def pad1(b):   # (a,) -> (Hp,)
        return jnp.pad(b, (0, Hp - b.shape[0]))

    w_ih_g = p["w_ih"].reshape(3, H, D)        # gate order (r, z, n)
    w_hh_g = p["w_hh"].reshape(3, H, H)
    b_ih_g = p["b_ih"].reshape(3, H)
    b_hh_g = p["b_hh"].reshape(3, H)

    # Per-gate transpose -> (in, out), pad, concat along the output/lane axis.
    w_ih_t = jnp.concatenate([pad2(w_ih_g[g].T) for g in range(3)], axis=1)  # (Hp,3Hp)
    w_hh_t = jnp.concatenate([pad2(w_hh_g[g].T) for g in range(3)], axis=1)  # (Hp,3Hp)

    # Fold b_hh_r, b_hh_z into the input-side bias; b_hh_n must stay separate
    # (it sits inside r * (h @ W_hn^T + b_hn)).
    b_comb = jnp.concatenate([pad1(b_ih_g[0] + b_hh_g[0]),
                              pad1(b_ih_g[1] + b_hh_g[1]),
                              pad1(b_ih_g[2])])                              # (3Hp,)

    return {
        "w_ih_t": w_ih_t.astype(jnp.bfloat16),
        "w_hh_t": w_hh_t.astype(jnp.bfloat16),
        "b_comb": b_comb[None, :].astype(jnp.float32),
        "b_hn": pad1(b_hh_g[2])[None, :].astype(jnp.float32),
        "w_g_t": pad2(p["w_g"].T).astype(jnp.bfloat16),
        "b_g": pad1(p["b_g"])[None, :].astype(jnp.float32),
    }


def _default_time_chunk(T, Bb, Hp, budget_bytes=8 << 20):
    # Chunk-proportional VMEM per time step: double-buffered x + out (f32) and
    # the gi (f32) + y (bf16) scratch rows.
    per_step = Bb * Hp * (2 * 4 + 2 * 4 + 3 * 4 + 2)
    tc_max = max(1, budget_bytes // per_step)
    tc = 1
    for d in range(1, T + 1):
        if T % d == 0 and d <= tc_max:
            tc = d
    return tc


def _vmem_limit_bytes(Tc, Bb, Hp):
    blk = Tc * Bb * Hp
    io = 2 * blk * 4 + 2 * blk * 4                                    # x, out (db)
    w = 2 * (2 * Hp * 3 * Hp * 2 + Hp * Hp * 2 + (3 * Hp + 3 * Hp) * 4)  # weights (db)
    scr = blk * 3 * 4 + blk * 2 + Bb * Hp * 4                         # gi, y, h
    small = 4 * Bb * Hp * 4                                           # h0, h_last
    need = io + w + scr + small
    return int(min(max(int(need * 1.5) + (2 << 20), 8 << 20), 48 << 20))


def masking_gru_pallas(x, h0, raw_params, *, time_chunk=None, batch_block=None):
    """x: (T, B, D) f32 (seq-first, like PyTorch GRU default); h0: (1, B, H).

    Returns (sigmoid(Linear(y)) * x of shape (T, B, D), final hidden (1, B, H)).
    """
    T, B, D = x.shape
    H = raw_params["w_hh"].shape[1]
    assert H == D, "gate Linear(D, D) on GRU output requires hidden == input"

    Hp = _round_up(max(H, 128), 128)           # lane-dense hidden/feature width
    Bp = _round_up(max(B, 8), 8)               # sublane-aligned batch

    Bb = batch_block if batch_block is not None else Bp
    assert Bp % Bb == 0 and Bb % 8 == 0
    nb = Bp // Bb                              # "parallel" batch blocks (v7x 2xTC)

    Tc = time_chunk if time_chunk is not None else _default_time_chunk(T, Bb, Hp)
    assert T % Tc == 0, "time_chunk must divide T"
    n_chunks = T // Tc

    kp = pack_params(raw_params, Hp)

    # Zero-pad activations: padded hidden units stay exactly 0 through the GRU,
    # padded batch rows are sliced off at the end.
    xp = jnp.zeros((T, Bp, Hp), x.dtype).at[:, :B, :D].set(x)
    h0p = jnp.zeros((Bp, Hp), jnp.float32).at[:B, :H].set(h0[0].astype(jnp.float32))

    out_p, h_p = pl.pallas_call(
        _masking_gru_kernel,
        out_shape=(
            jax.ShapeDtypeStruct((T, Bp, Hp), x.dtype),     # masked output
            jax.ShapeDtypeStruct((Bp, Hp), jnp.float32),    # final hidden (f32)
        ),
        grid_spec=pltpu.PrefetchScalarGridSpec(
            num_scalar_prefetch=0,
            grid=(nb, n_chunks),
            in_specs=[
                pl.BlockSpec((Tc, Bb, Hp), lambda bb, c: (c, bb, 0)),   # x chunk
                pl.BlockSpec((Bb, Hp), lambda bb, c: (bb, 0)),          # h0 block
                pl.BlockSpec((Hp, 3 * Hp), lambda bb, c: (0, 0)),       # W_ih^T (bf16)
                pl.BlockSpec((Hp, 3 * Hp), lambda bb, c: (0, 0)),       # W_hh^T (bf16)
                pl.BlockSpec((1, 3 * Hp), lambda bb, c: (0, 0)),        # folded bias
                pl.BlockSpec((1, Hp), lambda bb, c: (0, 0)),            # b_hh_n
                pl.BlockSpec((Hp, Hp), lambda bb, c: (0, 0)),           # W_gate^T (bf16)
                pl.BlockSpec((1, Hp), lambda bb, c: (0, 0)),            # b_gate
            ],
            out_specs=[
                pl.BlockSpec((Tc, Bb, Hp), lambda bb, c: (c, bb, 0)),   # out chunk
                pl.BlockSpec((Bb, Hp), lambda bb, c: (bb, 0)),          # final hidden
            ],
            scratch_shapes=[
                pltpu.VMEM((Tc, Bb, 3 * Hp), jnp.float32),   # gi chunk
                pltpu.VMEM((Tc, Bb, Hp), jnp.bfloat16),      # y chunk (gate matmul in)
                pltpu.VMEM((Bb, Hp), jnp.float32),           # hidden-state carry
            ],
        ),
        compiler_params=pltpu.CompilerParams(
            dimension_semantics=("parallel", "arbitrary"),
            vmem_limit_bytes=_vmem_limit_bytes(Tc, Bb, Hp)),
    )(xp, h0p, kp["w_ih_t"], kp["w_hh_t"], kp["b_comb"], kp["b_hn"],
      kp["w_g_t"], kp["b_g"])

    out = out_p[:, :B, :D]
    h_last = h_p[:B, :H].astype(h0.dtype)[None]
    return out, h_last


# ----------------------------------------------------------------------------
# Pure-JAX f32 reference (PyTorch GRU equations, gate order r,z,n).
# ----------------------------------------------------------------------------
def masking_gru_ref(x, h0, p):
    w_ir, w_iz, w_in = jnp.split(p["w_ih"], 3, axis=0)
    w_hr, w_hz, w_hn = jnp.split(p["w_hh"], 3, axis=0)
    b_ir, b_iz, b_in = jnp.split(p["b_ih"], 3)
    b_hr, b_hz, b_hn = jnp.split(p["b_hh"], 3)

    def step(h, x_t):
        r = jax.nn.sigmoid(x_t @ w_ir.T + b_ir + h @ w_hr.T + b_hr)
        z = jax.nn.sigmoid(x_t @ w_iz.T + b_iz + h @ w_hz.T + b_hz)
        n = jnp.tanh(x_t @ w_in.T + b_in + r * (h @ w_hn.T + b_hn))
        h_new = (1.0 - z) * n + z * h
        return h_new, h_new

    h_last, y = lax.scan(step, h0[0], x)
    g = jax.nn.sigmoid(y @ p["w_g"].T + p["b_g"])
    return g * x, h_last[None]


def init_params(key, input_size, hidden_size):
    """Deterministic init mirroring nn.GRU / nn.Linear parameter shapes."""
    D, H = input_size, hidden_size
    ks = jax.random.split(key, 6)
    s = 1.0 / np.sqrt(H)
    u = lambda k, shape: jax.random.uniform(k, shape, jnp.float32, -s, s)
    return {
        "w_ih": u(ks[0], (3 * H, D)),    # PyTorch weight_ih_l0 (r, z, n)
        "w_hh": u(ks[1], (3 * H, H)),    # PyTorch weight_hh_l0
        "b_ih": u(ks[2], (3 * H,)),
        "b_hh": u(ks[3], (3 * H,)),
        "w_g": u(ks[4], (D, D)),         # gate Linear weight (out, in)
        "b_g": u(ks[5], (D,)),
    }


if __name__ == "__main__":
    T, B, D = 8, 2, 32     # seq len, batch, input_size == hidden_size
    H = D

    key = jax.random.PRNGKey(0)
    kx, kh, kp = jax.random.split(key, 3)
    x = jax.random.normal(kx, (T, B, D), jnp.float32)
    h0 = jax.random.normal(kh, (1, B, H), jnp.float32)
    params = init_params(kp, D, H)

    # time_chunk=4 -> 2 grid steps along the "arbitrary" axis, exercising the
    # chunked (double-buffered) pipeline path.
    out, h = masking_gru_pallas(x, h0, params, time_chunk=4)
    out = jax.block_until_ready(out)
    h = jax.block_until_ready(h)

    out_ref, h_ref = masking_gru_ref(x, h0, params)
    # bf16 matmul inputs (f32 accumulation / f32 hidden carry) -> 5e-2 tolerance
    # vs the pure-f32 reference.
    np.testing.assert_allclose(np.asarray(out), np.asarray(out_ref), rtol=5e-2, atol=5e-2)
    np.testing.assert_allclose(np.asarray(h), np.asarray(h_ref), rtol=5e-2, atol=5e-2)

    print("KERNEL_OK")
</pallas_src>

<mosaic_0001>
module attributes {stable_mosaic.version = 11 : i64} {
  func.func @_masking_gru_kernel(%arg0: i32, %arg1: i32, %arg2: memref<4x8x128xf32, #tpu.memory_space<vmem>>, %arg3: memref<8x128xf32, #tpu.memory_space<vmem>>, %arg4: memref<128x384xbf16, #tpu.memory_space<vmem>>, %arg5: memref<128x384xbf16, #tpu.memory_space<vmem>>, %arg6: memref<1x384xf32, #tpu.memory_space<vmem>>, %arg7: memref<1x128xf32, #tpu.memory_space<vmem>>, %arg8: memref<128x128xbf16, #tpu.memory_space<vmem>>, %arg9: memref<1x128xf32, #tpu.memory_space<vmem>>, %arg10: memref<4x8x128xf32, #tpu.memory_space<vmem>>, %arg11: memref<8x128xf32, #tpu.memory_space<vmem>>, %arg12: memref<4x8x384xf32, #tpu.memory_space<vmem>>, %arg13: memref<4x8x128xbf16, #tpu.memory_space<vmem>>, %arg14: memref<8x128xf32, #tpu.memory_space<vmem>>) attributes {dimension_semantics = [#tpu.dimension_semantics<parallel>, #tpu.dimension_semantics<arbitrary>], iteration_bounds = array<i64: 1, 2>, scalar_prefetch = 0 : i64, scratch_operands = 3 : i64, tpu.core_type = #tpu.core_type<tc>, window_params = [{transform_indices = @transform_0, window_bounds = array<i64: 4, 8, 128>}, {transform_indices = @transform_1, window_bounds = array<i64: 8, 128>}, {pipeline_mode = #tpu.pipeline_mode<synchronous>, transform_indices = @transform_2, window_bounds = array<i64: 128, 384>}, {pipeline_mode = #tpu.pipeline_mode<synchronous>, transform_indices = @transform_3, window_bounds = array<i64: 128, 384>}, {pipeline_mode = #tpu.pipeline_mode<synchronous>, transform_indices = @transform_4, window_bounds = array<i64: 1, 384>}, {pipeline_mode = #tpu.pipeline_mode<synchronous>, transform_indices = @transform_5, window_bounds = array<i64: 1, 128>}, {pipeline_mode = #tpu.pipeline_mode<synchronous>, transform_indices = @transform_6, window_bounds = array<i64: 128, 128>}, {pipeline_mode = #tpu.pipeline_mode<synchronous>, transform_indices = @transform_7, window_bounds = array<i64: 1, 128>}, {transform_indices = @transform_8, window_bounds = array<i64: 4, 8, 128>}, {transform_indices = @transform_9, window_bounds = array<i64: 8, 128>}]} {
    %c0_i32 = arith.constant 0 : i32
    %0 = arith.cmpi eq, %arg1, %c0_i32 : i32
    %1 = arith.extui %0 : i1 to i32
    %c0_i32_0 = arith.constant 0 : i32
    %2 = arith.cmpi ne, %1, %c0_i32_0 : i32
    scf.if %2 {
      %c0_77 = arith.constant 0 : index
      %c0_78 = arith.constant 0 : index
      %182 = vector.load %arg3[%c0_77, %c0_78] : memref<8x128xf32, #tpu.memory_space<vmem>>, vector<8x128xf32>
      %c0_79 = arith.constant 0 : index
      %c0_80 = arith.constant 0 : index
      %183 = vector.load %arg14[%c0_79, %c0_80] : memref<8x128xf32, #tpu.memory_space<vmem>>, vector<8x128xf32>
      tpu.vector_store %arg14[%c0_79, %c0_80], %182 {strides = array<i32>} : memref<8x128xf32, #tpu.memory_space<vmem>>, vector<8x128xf32>,
    } else {
    }
    %c0 = arith.constant 0 : index
    %c0_1 = arith.constant 0 : index
    %c0_2 = arith.constant 0 : index
    %3 = vector.load %arg2[%c0, %c0_1, %c0_2] : memref<4x8x128xf32, #tpu.memory_space<vmem>>, vector<4x8x128xf32>
    %4 = arith.truncf %3 : vector<4x8x128xf32> to vector<4x8x128xbf16>
    %5 = vector.shape_cast %4 : vector<4x8x128xbf16> to vector<32x128xbf16>
    %c0_3 = arith.constant 0 : index
    %c0_4 = arith.constant 0 : index
    %6 = vector.load %arg4[%c0_3, %c0_4] : memref<128x384xbf16, #tpu.memory_space<vmem>>, vector<128x384xbf16>
    %cst = arith.constant dense<0.000000e+00> : vector<32x384xf32>
    %7 = tpu.matmul %5, %6, %cst {dimension_numbers = #tpu.dot_dimension_numbers<[1], [0], [0], [1], [0, 0, 1, 1], [], []>} : vector<32x128xbf16>, vector<128x384xbf16>, vector<32x384xf32> -> vector<32x384xf32>
    %c0_5 = arith.constant 0 : index
    %c0_6 = arith.constant 0 : index
    %8 = vector.load %arg6[%c0_5, %c0_6] : memref<1x384xf32, #tpu.memory_space<vmem>>, vector<1x384xf32>
    %9 = vector.broadcast %8 : vector<1x384xf32> to vector<32x384xf32>
    %10 = arith.addf %7, %9 : vector<32x384xf32>
    %11 = vector.shape_cast %10 : vector<32x384xf32> to vector<4x8x384xf32>
    %c0_7 = arith.constant 0 : index
    %c0_8 = arith.constant 0 : index
    %c0_9 = arith.constant 0 : index
    %12 = vector.load %arg12[%c0_7, %c0_8, %c0_9] : memref<4x8x384xf32, #tpu.memory_space<vmem>>, vector<4x8x384xf32>
    tpu.vector_store %arg12[%c0_7, %c0_8, %c0_9], %11 {strides = array<i32>} : memref<4x8x384xf32, #tpu.memory_space<vmem>>, vector<4x8x384xf32>,
    %c0_10 = arith.constant 0 : index
    %c0_11 = arith.constant 0 : index
    %13 = vector.load %arg7[%c0_10, %c0_11] : memref<1x128xf32, #tpu.memory_space<vmem>>, vector<1x128xf32>
    %14 = vector.shape_cast %13 : vector<1x128xf32> to vector<1x128xf32>
    %15 = vector.broadcast %14 : vector<1x128xf32> to vector<8x128xf32>
    %c0_12 = arith.constant 0 : index
    %c0_13 = arith.constant 0 : index
    %16 = vector.load %arg14[%c0_12, %c0_13] : memref<8x128xf32, #tpu.memory_space<vmem>>, vector<8x128xf32>
    %17 = arith.truncf %16 : vector<8x128xf32> to vector<8x128xbf16>
    %c0_14 = arith.constant 0 : index
    %c0_15 = arith.constant 0 : index
    %18 = vector.load %arg5[%c0_14, %c0_15] : memref<128x384xbf16, #tpu.memory_space<vmem>>, vector<128x384xbf16>
    %cst_16 = arith.constant dense<0.000000e+00> : vector<8x384xf32>
    %19 = tpu.matmul %17, %18, %cst_16 {dimension_numbers = #tpu.dot_dimension_numbers<[1], [0], [0], [1], [0, 0, 1, 1], [], []>} : vector<8x128xbf16>, vector<128x384xbf16>, vector<8x384xf32> -> vector<8x384xf32>
    %c0_17 = arith.constant 0 : index
    %c0_18 = arith.constant 0 : index
    %c0_19 = arith.constant 0 : index
    %20 = vector.load %arg12[%c0_17, %c0_18, %c0_19] : memref<4x8x384xf32, #tpu.memory_space<vmem>>, vector<1x8x384xf32>
    %21 = vector.shape_cast %20 : vector<1x8x384xf32> to vector<8x384xf32>
    %22 = vector.extract_strided_slice %21 {offsets = [0, 0], sizes = [8, 128], strides = [1, 1]} : vector<8x384xf32> to vector<8x128xf32>
    %23 = vector.extract_strided_slice %19 {offsets = [0, 0], sizes = [8, 128], strides = [1, 1]} : vector<8x384xf32> to vector<8x128xf32>
    %24 = arith.addf %22, %23 : vector<8x128xf32>
    %25 = arith.negf %24 : vector<8x128xf32>
    %26 = math.exp %25 : vector<8x128xf32>
    %cst_20 = arith.constant 1.000000e+00 : f32
    %27 = vector.broadcast %cst_20 : f32 to vector<8x128xf32>
    %28 = arith.addf %27, %26 : vector<8x128xf32>
    %29 = arith.divf %27, %28 : vector<8x128xf32>
    %30 = vector.extract_strided_slice %21 {offsets = [0, 128], sizes = [8, 128], strides = [1, 1]} : vector<8x384xf32> to vector<8x128xf32>
    %31 = vector.extract_strided_slice %19 {offsets = [0, 128], sizes = [8, 128], strides = [1, 1]} : vector<8x384xf32> to vector<8x128xf32>
    %32 = arith.addf %30, %31 : vector<8x128xf32>
    %33 = arith.negf %32 : vector<8x128xf32>
    %34 = math.exp %33 : vector<8x128xf32>
    %cst_21 = arith.constant 1.000000e+00 : f32
    %35 = vector.broadcast %cst_21 : f32 to vector<8x128xf32>
    %36 = arith.addf %35, %34 : vector<8x128xf32>
    %37 = arith.divf %35, %36 : vector<8x128xf32>
    %38 = vector.extract_strided_slice %21 {offsets = [0, 256], sizes = [8, 128], strides = [1, 1]} : vector<8x384xf32> to vector<8x128xf32>
    %39 = vector.extract_strided_slice %19 {offsets = [0, 256], sizes = [8, 128], strides = [1, 1]} : vector<8x384xf32> to vector<8x128xf32>
    %40 = arith.addf %39, %15 : vector<8x128xf32>
    %41 = arith.mulf %29, %40 : vector<8x128xf32>
    %42 = arith.addf %38, %41 : vector<8x128xf32>
    %43 = math.tanh %42 : vector<8x128xf32>
    %cst_22 = arith.constant 1.000000e+00 : f32
    %44 = vector.broadcast %cst_22 : f32 to vector<8x128xf32>
    %45 = arith.subf %44, %37 : vector<8x128xf32>
    %46 = arith.mulf %45, %43 : vector<8x128xf32>
    %47 = arith.mulf %37, %16 : vector<8x128xf32>
    %48 = arith.addf %46, %47 : vector<8x128xf32>
    %49 = arith.truncf %48 : vector<8x128xf32> to vector<8x128xbf16>
    %c0_23 = arith.constant 0 : index
    %c0_24 = arith.constant 0 : index
    %c0_25 = arith.constant 0 : index
    %50 = vector.load %arg13[%c0_23, %c0_24, %c0_25] : memref<4x8x128xbf16, #tpu.memory_space<vmem>>, vector<1x8x128xbf16>
    %51 = vector.shape_cast %50 : vector<1x8x128xbf16> to vector<8x128xbf16>
    %52 = vector.shape_cast %49 : vector<8x128xbf16> to vector<1x8x128xbf16>
    tpu.vector_store %arg13[%c0_23, %c0_24, %c0_25], %52 {strides = array<i32>} : memref<4x8x128xbf16, #tpu.memory_space<vmem>>, vector<1x8x128xbf16>,
    %53 = arith.truncf %48 : vector<8x128xf32> to vector<8x128xbf16>
    %c0_26 = arith.constant 0 : index
    %c0_27 = arith.constant 0 : index
    %54 = vector.load %arg5[%c0_26, %c0_27] : memref<128x384xbf16, #tpu.memory_space<vmem>>, vector<128x384xbf16>
    %cst_28 = arith.constant dense<0.000000e+00> : vector<8x384xf32>
    %55 = tpu.matmul %53, %54, %cst_28 {dimension_numbers = #tpu.dot_dimension_numbers<[1], [0], [0], [1], [0, 0, 1, 1], [], []>} : vector<8x128xbf16>, vector<128x384xbf16>, vector<8x384xf32> -> vector<8x384xf32>
    %c1 = arith.constant 1 : index
    %c0_29 = arith.constant 0 : index
    %c0_30 = arith.constant 0 : index
    %56 = vector.load %arg12[%c1, %c0_29, %c0_30] : memref<4x8x384xf32, #tpu.memory_space<vmem>>, vector<1x8x384xf32>
    %57 = vector.shape_cast %56 : vector<1x8x384xf32> to vector<8x384xf32>
    %58 = vector.extract_strided_slice %57 {offsets = [0, 0], sizes = [8, 128], strides = [1, 1]} : vector<8x384xf32> to vector<8x128xf32>
    %59 = vector.extract_strided_slice %55 {offsets = [0, 0], sizes = [8, 128], strides = [1, 1]} : vector<8x384xf32> to vector<8x128xf32>
    %60 = arith.addf %58, %59 : vector<8x128xf32>
    %61 = arith.negf %60 : vector<8x128xf32>
    %62 = math.exp %61 : vector<8x128xf32>
    %cst_31 = arith.constant 1.000000e+00 : f32
    %63 = vector.broadcast %cst_31 : f32 to vector<8x128xf32>
    %64 = arith.addf %63, %62 : vector<8x128xf32>
    %65 = arith.divf %63, %64 : vector<8x128xf32>
    %66 = vector.extract_strided_slice %57 {offsets = [0, 128], sizes = [8, 128], strides = [1, 1]} : vector<8x384xf32> to vector<8x128xf32>
    %67 = vector.extract_strided_slice %55 {offsets = [0, 128], sizes = [8, 128], strides = [1, 1]} : vector<8x384xf32> to vector<8x128xf32>
    %68 = arith.addf %66, %67 : vector<8x128xf32>
    %69 = arith.negf %68 : vector<8x128xf32>
    %70 = math.exp %69 : vector<8x128xf32>
    %cst_32 = arith.constant 1.000000e+00 : f32
    %71 = vector.broadcast %cst_32 : f32 to vector<8x128xf32>
    %72 = arith.addf %71, %70 : vector<8x128xf32>
    %73 = arith.divf %71, %72 : vector<8x128xf32>
    %74 = vector.extract_strided_slice %57 {offsets = [0, 256], sizes = [8, 128], strides = [1, 1]} : vector<8x384xf32> to vector<8x128xf32>
    %75 = vector.extract_strided_slice %55 {offsets = [0, 256], sizes = [8, 128], strides = [1, 1]} : vector<8x384xf32> to vector<8x128xf32>
    %76 = arith.addf %75, %15 : vector<8x128xf32>
    %77 = arith.mulf %65, %76 : vector<8x128xf32>
    %78 = arith.addf %74, %77 : vector<8x128xf32>
    %79 = math.tanh %78 : vector<8x128xf32>
    %cst_33 = arith.constant 1.000000e+00 : f32
    %80 = vector.broadcast %cst_33 : f32 to vector<8x128xf32>
    %81 = arith.subf %80, %73 : vector<8x128xf32>
    %82 = arith.mulf %81, %79 : vector<8x128xf32>
    %83 = arith.mulf %73, %48 : vector<8x128xf32>
    %84 = arith.addf %82, %83 : vector<8x128xf32>
    %85 = arith.truncf %84 : vector<8x128xf32> to vector<8x128xbf16>
    %c1_34 = arith.constant 1 : index
    %c0_35 = arith.constant 0 : index
    %c0_36 = arith.constant 0 : index
    %86 = vector.load %arg13[%c1_34, %c0_35, %c0_36] : memref<4x8x128xbf16, #tpu.memory_space<vmem>>, vector<1x8x128xbf16>
    %87 = vector.shape_cast %86 : vector<1x8x128xbf16> to vector<8x128xbf16>
    %88 = vector.shape_cast %85 : vector<8x128xbf16> to vector<1x8x128xbf16>
    tpu.vector_store %arg13[%c1_34, %c0_35, %c0_36], %88 {strides = array<i32>} : memref<4x8x128xbf16, #tpu.memory_space<vmem>>, vector<1x8x128xbf16>,
    %89 = arith.truncf %84 : vector<8x128xf32> to vector<8x128xbf16>
    %c0_37 = arith.constant 0 : index
    %c0_38 = arith.constant 0 : index
    %90 = vector.load %arg5[%c0_37, %c0_38] : memref<128x384xbf16, #tpu.memory_space<vmem>>, vector<128x384xbf16>
    %cst_39 = arith.constant dense<0.000000e+00> : vector<8x384xf32>
    %91 = tpu.matmul %89, %90, %cst_39 {dimension_numbers = #tpu.dot_dimension_numbers<[1], [0], [0], [1], [0, 0, 1, 1], [], []>} : vector<8x128xbf16>, vector<128x384xbf16>, vector<8x384xf32> -> vector<8x384xf32>
    %c2 = arith.constant 2 : index
    %c0_40 = arith.constant 0 : index
    %c0_41 = arith.constant 0 : index
    %92 = vector.load %arg12[%c2, %c0_40, %c0_41] : memref<4x8x384xf32, #tpu.memory_space<vmem>>, vector<1x8x384xf32>
    %93 = vector.shape_cast %92 : vector<1x8x384xf32> to vector<8x384xf32>
    %94 = vector.extract_strided_slice %93 {offsets = [0, 0], sizes = [8, 128], strides = [1, 1]} : vector<8x384xf32> to vector<8x128xf32>
    %95 = vector.extract_strided_slice %91 {offsets = [0, 0], sizes = [8, 128], strides = [1, 1]} : vector<8x384xf32> to vector<8x128xf32>
    %96 = arith.addf %94, %95 : vector<8x128xf32>
    %97 = arith.negf %96 : vector<8x128xf32>
    %98 = math.exp %97 : vector<8x128xf32>
    %cst_42 = arith.constant 1.000000e+00 : f32
    %99 = vector.broadcast %cst_42 : f32 to vector<8x128xf32>
    %100 = arith.addf %99, %98 : vector<8x128xf32>
    %101 = arith.divf %99, %100 : vector<8x128xf32>
    %102 = vector.extract_strided_slice %93 {offsets = [0, 128], sizes = [8, 128], strides = [1, 1]} : vector<8x384xf32> to vector<8x128xf32>
    %103 = vector.extract_strided_slice %91 {offsets = [0, 128], sizes = [8, 128], strides = [1, 1]} : vector<8x384xf32> to vector<8x128xf32>
    %104 = arith.addf %102, %103 : vector<8x128xf32>
    %105 = arith.negf %104 : vector<8x128xf32>
    %106 = math.exp %105 : vector<8x128xf32>
    %cst_43 = arith.constant 1.000000e+00 : f32
    %107 = vector.broadcast %cst_43 : f32 to vector<8x128xf32>
    %108 = arith.addf %107, %106 : vector<8x128xf32>
    %109 = arith.divf %107, %108 : vector<8x128xf32>
    %110 = vector.extract_strided_slice %93 {offsets = [0, 256], sizes = [8, 128], strides = [1, 1]} : vector<8x384xf32> to vector<8x128xf32>
    %111 = vector.extract_strided_slice %91 {offsets = [0, 256], sizes = [8, 128], strides = [1, 1]} : vector<8x384xf32> to vector<8x128xf32>
    %112 = arith.addf %111, %15 : vector<8x128xf32>
    %113 = arith.mulf %101, %112 : vector<8x128xf32>
    %114 = arith.addf %110, %113 : vector<8x128xf32>
    %115 = math.tanh %114 : vector<8x128xf32>
    %cst_44 = arith.constant 1.000000e+00 : f32
    %116 = vector.broadcast %cst_44 : f32 to vector<8x128xf32>
    %117 = arith.subf %116, %109 : vector<8x128xf32>
    %118 = arith.mulf %117, %115 : vector<8x128xf32>
    %119 = arith.mulf %109, %84 : vector<8x128xf32>
    %120 = arith.addf %118, %119 : vector<8x128xf32>
    %121 = arith.truncf %120 : vector<8x128xf32> to vector<8x128xbf16>
    %c2_45 = arith.constant 2 : index
    %c0_46 = arith.constant 0 : index
    %c0_47 = arith.constant 0 : index
    %122 = vector.load %arg13[%c2_45, %c0_46, %c0_47] : memref<4x8x128xbf16, #tpu.memory_space<vmem>>, vector<1x8x128xbf16>
    %123 = vector.shape_cast %122 : vector<1x8x128xbf16> to vector<8x128xbf16>
    %124 = vector.shape_cast %121 : vector<8x128xbf16> to vector<1x8x128xbf16>
    tpu.vector_store %arg13[%c2_45, %c0_46, %c0_47], %124 {strides = array<i32>} : memref<4x8x128xbf16, #tpu.memory_space<vmem>>, vector<1x8x128xbf16>,
    %125 = arith.truncf %120 : vector<8x128xf32> to vector<8x128xbf16>
    %c0_48 = arith.constant 0 : index
    %c0_49 = arith.constant 0 : index
    %126 = vector.load %arg5[%c0_48, %c0_49] : memref<128x384xbf16, #tpu.memory_space<vmem>>, vector<128x384xbf16>
    %cst_50 = arith.constant dense<0.000000e+00> : vector<8x384xf32>
    %127 = tpu.matmul %125, %126, %cst_50 {dimension_numbers = #tpu.dot_dimension_numbers<[1], [0], [0], [1], [0, 0, 1, 1], [], []>} : vector<8x128xbf16>, vector<128x384xbf16>, vector<8x384xf32> -> vector<8x384xf32>
    %c3 = arith.constant 3 : index
    %c0_51 = arith.constant 0 : index
    %c0_52 = arith.constant 0 : index
    %128 = vector.load %arg12[%c3, %c0_51, %c0_52] : memref<4x8x384xf32, #tpu.memory_space<vmem>>, vector<1x8x384xf32>
    %129 = vector.shape_cast %128 : vector<1x8x384xf32> to vector<8x384xf32>
    %130 = vector.extract_strided_slice %129 {offsets = [0, 0], sizes = [8, 128], strides = [1, 1]} : vector<8x384xf32> to vector<8x128xf32>
    %131 = vector.extract_strided_slice %127 {offsets = [0, 0], sizes = [8, 128], strides = [1, 1]} : vector<8x384xf32> to vector<8x128xf32>
    %132 = arith.addf %130, %131 : vector<8x128xf32>
    %133 = arith.negf %132 : vector<8x128xf32>
    %134 = math.exp %133 : vector<8x128xf32>
    %cst_53 = arith.constant 1.000000e+00 : f32
    %135 = vector.broadcast %cst_53 : f32 to vector<8x128xf32>
    %136 = arith.addf %135, %134 : vector<8x128xf32>
    %137 = arith.divf %135, %136 : vector<8x128xf32>
    %138 = vector.extract_strided_slice %129 {offsets = [0, 128], sizes = [8, 128], strides = [1, 1]} : vector<8x384xf32> to vector<8x128xf32>
    %139 = vector.extract_strided_slice %127 {offsets = [0, 128], sizes = [8, 128], strides = [1, 1]} : vector<8x384xf32> to vector<8x128xf32>
    %140 = arith.addf %138, %139 : vector<8x128xf32>
    %141 = arith.negf %140 : vector<8x128xf32>
    %142 = math.exp %141 : vector<8x128xf32>
    %cst_54 = arith.constant 1.000000e+00 : f32
    %143 = vector.broadcast %cst_54 : f32 to vector<8x128xf32>
    %144 = arith.addf %143, %142 : vector<8x128xf32>
    %145 = arith.divf %143, %144 : vector<8x128xf32>
    %146 = vector.extract_strided_slice %129 {offsets = [0, 256], sizes = [8, 128], strides = [1, 1]} : vector<8x384xf32> to vector<8x128xf32>
    %147 = vector.extract_strided_slice %127 {offsets = [0, 256], sizes = [8, 128], strides = [1, 1]} : vector<8x384xf32> to vector<8x128xf32>
    %148 = arith.addf %147, %15 : vector<8x128xf32>
    %149 = arith.mulf %137, %148 : vector<8x128xf32>
    %150 = arith.addf %146, %149 : vector<8x128xf32>
    %151 = math.tanh %150 : vector<8x128xf32>
    %cst_55 = arith.constant 1.000000e+00 : f32
    %152 = vector.broadcast %cst_55 : f32 to vector<8x128xf32>
    %153 = arith.subf %152, %145 : vector<8x128xf32>
    %154 = arith.mulf %153, %151 : vector<8x128xf32>
    %155 = arith.mulf %145, %120 : vector<8x128xf32>
    %156 = arith.addf %154, %155 : vector<8x128xf32>
    %157 = arith.truncf %156 : vector<8x128xf32> to vector<8x128xbf16>
    %c3_56 = arith.constant 3 : index
    %c0_57 = arith.constant 0 : index
    %c0_58 = arith.constant 0 : index
    %158 = vector.load %arg13[%c3_56, %c0_57, %c0_58] : memref<4x8x128xbf16, #tpu.memory_space<vmem>>, vector<1x8x128xbf16>
    %159 = vector.shape_cast %158 : vector<1x8x128xbf16> to vector<8x128xbf16>
    %160 = vector.shape_cast %157 : vector<8x128xbf16> to vector<1x8x128xbf16>
    tpu.vector_store %arg13[%c3_56, %c0_57, %c0_58], %160 {strides = array<i32>} : memref<4x8x128xbf16, #tpu.memory_space<vmem>>, vector<1x8x128xbf16>,
    %c0_59 = arith.constant 0 : index
    %c0_60 = arith.constant 0 : index
    %161 = vector.load %arg14[%c0_59, %c0_60] : memref<8x128xf32, #tpu.memory_space<vmem>>, vector<8x128xf32>
    tpu.vector_store %arg14[%c0_59, %c0_60], %156 {strides = array<i32>} : memref<8x128xf32, #tpu.memory_space<vmem>>, vector<8x128xf32>,
    %c0_61 = arith.constant 0 : index
    %c0_62 = arith.constant 0 : index
    %c0_63 = arith.constant 0 : index
    %162 = vector.load %arg13[%c0_61, %c0_62, %c0_63] : memref<4x8x128xbf16, #tpu.memory_space<vmem>>, vector<4x8x128xbf16>
    %163 = vector.shape_cast %162 : vector<4x8x128xbf16> to vector<32x128xbf16>
    %c0_64 = arith.constant 0 : index
    %c0_65 = arith.constant 0 : index
    %164 = vector.load %arg8[%c0_64, %c0_65] : memref<128x128xbf16, #tpu.memory_space<vmem>>, vector<128x128xbf16>
    %cst_66 = arith.constant dense<0.000000e+00> : vector<32x128xf32>
    %165 = tpu.matmul %163, %164, %cst_66 {dimension_numbers = #tpu.dot_dimension_numbers<[1], [0], [0], [1], [0, 0, 1, 1], [], []>} : vector<32x128xbf16>, vector<128x128xbf16>, vector<32x128xf32> -> vector<32x128xf32>
    %c0_67 = arith.constant 0 : index
    %c0_68 = arith.constant 0 : index
    %166 = vector.load %arg9[%c0_67, %c0_68] : memref<1x128xf32, #tpu.memory_space<vmem>>, vector<1x128xf32>
    %167 = vector.broadcast %166 : vector<1x128xf32> to vector<32x128xf32>
    %168 = arith.addf %165, %167 : vector<32x128xf32>
    %169 = arith.negf %168 : vector<32x128xf32>
    %170 = math.exp %169 : vector<32x128xf32>
    %cst_69 = arith.constant 1.000000e+00 : f32
    %171 = vector.broadcast %cst_69 : f32 to vector<32x128xf32>
    %172 = arith.addf %171, %170 : vector<32x128xf32>
    %173 = arith.divf %171, %172 : vector<32x128xf32>
    %c0_70 = arith.constant 0 : index
    %c0_71 = arith.constant 0 : index
    %c0_72 = arith.constant 0 : index
    %174 = vector.load %arg2[%c0_70, %c0_71, %c0_72] : memref<4x8x128xf32, #tpu.memory_space<vmem>>, vector<4x8x128xf32>
    %175 = vector.shape_cast %174 : vector<4x8x128xf32> to vector<32x128xf32>
    %176 = arith.mulf %173, %175 : vector<32x128xf32>
    %177 = vector.shape_cast %176 : vector<32x128xf32> to vector<4x8x128xf32>
    %c0_73 = arith.constant 0 : index
    %c0_74 = arith.constant 0 : index
    %c0_75 = arith.constant 0 : index
    %178 = vector.load %arg10[%c0_73, %c0_74, %c0_75] : memref<4x8x128xf32, #tpu.memory_space<vmem>>, vector<4x8x128xf32>
    tpu.vector_store %arg10[%c0_73, %c0_74, %c0_75], %177 {strides = array<i32>} : memref<4x8x128xf32, #tpu.memory_space<vmem>>, vector<4x8x128xf32>,
    %c1_i32 = arith.constant 1 : i32
    %179 = arith.cmpi eq, %arg1, %c1_i32 : i32
    %180 = arith.extui %179 : i1 to i32
    %c0_i32_76 = arith.constant 0 : i32
    %181 = arith.cmpi ne, %180, %c0_i32_76 : i32
    scf.if %181 {
      %c0_77 = arith.constant 0 : index
      %c0_78 = arith.constant 0 : index
      %182 = vector.load %arg11[%c0_77, %c0_78] : memref<8x128xf32, #tpu.memory_space<vmem>>, vector<8x128xf32>
      tpu.vector_store %arg11[%c0_77, %c0_78], %156 {strides = array<i32>} : memref<8x128xf32, #tpu.memory_space<vmem>>, vector<8x128xf32>,
    } else {
    }
    return
  }
  func.func @transform_0(%arg0: i32, %arg1: i32) -> (i32, i32, i32) {
    %c0_i32 = arith.constant 0 : i32
    %c0_i32_0 = arith.constant 0 : i32
    return %arg1, %arg0, %c0_i32 : i32, i32, i32
  }
  func.func @transform_1(%arg0: i32, %arg1: i32) -> (i32, i32) {
    %c0_i32 = arith.constant 0 : i32
    %c0_i32_0 = arith.constant 0 : i32
    return %arg0, %c0_i32 : i32, i32
  }
  func.func @transform_2(%arg0: i32, %arg1: i32) -> (i32, i32) {
    %c0_i32 = arith.constant 0 : i32
    %c0_i32_0 = arith.constant 0 : i32
    %c0_i32_1 = arith.constant 0 : i32
    return %c0_i32, %c0_i32_0 : i32, i32
  }
  func.func @transform_3(%arg0: i32, %arg1: i32) -> (i32, i32) {
    %c0_i32 = arith.constant 0 : i32
    %c0_i32_0 = arith.constant 0 : i32
    %c0_i32_1 = arith.constant 0 : i32
    return %c0_i32, %c0_i32_0 : i32, i32
  }
  func.func @transform_4(%arg0: i32, %arg1: i32) -> (i32, i32) {
    %c0_i32 = arith.constant 0 : i32
    %c0_i32_0 = arith.constant 0 : i32
    %c0_i32_1 = arith.constant 0 : i32
    return %c0_i32, %c0_i32_0 : i32, i32
  }
  func.func @transform_5(%arg0: i32, %arg1: i32) -> (i32, i32) {
    %c0_i32 = arith.constant 0 : i32
    %c0_i32_0 = arith.constant 0 : i32
    %c0_i32_1 = arith.constant 0 : i32
    return %c0_i32, %c0_i32_0 : i32, i32
  }
  func.func @transform_6(%arg0: i32, %arg1: i32) -> (i32, i32) {
    %c0_i32 = arith.constant 0 : i32
    %c0_i32_0 = arith.constant 0 : i32
    %c0_i32_1 = arith.constant 0 : i32
    return %c0_i32, %c0_i32_0 : i32, i32
  }
  func.func @transform_7(%arg0: i32, %arg1: i32) -> (i32, i32) {
    %c0_i32 = arith.constant 0 : i32
    %c0_i32_0 = arith.constant 0 : i32
    %c0_i32_1 = arith.constant 0 : i32
    return %c0_i32, %c0_i32_0 : i32, i32
  }
  func.func @transform_8(%arg0: i32, %arg1: i32) -> (i32, i32, i32) {
    %c0_i32 = arith.constant 0 : i32
    %c0_i32_0 = arith.constant 0 : i32
    return %arg1, %arg0, %c0_i32 : i32, i32, i32
  }
  func.func @transform_9(%arg0: i32, %arg1: i32) -> (i32, i32) {
    %c0_i32 = arith.constant 0 : i32
    %c0_i32_0 = arith.constant 0 : i32
    return %arg0, %c0_i32 : i32, i32
  }
}

</mosaic_0001>

<bundles_post_ra>
// kernel: tpu_custom_call.1
= control target key start
LH: loop header
LB: loop body
LE: loop exit
PB: predicated region body
PF: predicated region fallthrough
CT: control target
= control target key end

     0   :  { %s3677_s0 = inlined_call_operand.hbm [shape: f32[8,8,128], index: 0, kind: input, shape index: {}]   ;;  %s3678_s1 = inlined_call_operand.hbm [shape: f32[8,128], index: 1, kind: input, shape index: {}]   ;;  %s3679_s2 = inlined_call_operand.hbm [shape: bf16[128,384], index: 2, kind: input, shape index: {}]   ;;  %s3680_s3 = inlined_call_operand.hbm [shape: bf16[128,384], index: 3, kind: input, shape index: {}]   ;;  %s3681_s4 = inlined_call_operand.vmem [shape: f32[1,384], index: 4, kind: input, shape index: {}]   ;;  %s3682_s5 = inlined_call_operand.vmem [shape: f32[1,128], index: 5, kind: input, shape index: {}]   ;;  %s3683_s6 = inlined_call_operand.hbm [shape: bf16[128,128], index: 6, kind: input, shape index: {}]   ;;  %s3684_s7 = inlined_call_operand.vmem [shape: f32[1,128], index: 7, kind: input, shape index: {}]   ;;  %s3685_s8 = inlined_call_operand.hbm [shape: f32[8,8,128], index: 8, kind: output, shape index: {0}]   ;;  %s3686_s9 = inlined_call_operand.hbm [shape: f32[8,128], index: 9, kind: output, shape index: {1}]  }
   0x1   :  { %3696 = sst [smem:[#allocation24_spill]] %s3678_s1 }
   0x2   :  { %3697 = sst [smem:[#allocation25_spill]] %s3680_s3 }
   0x3   :  { %3698 = sst [smem:[#allocation26_spill]] %s3685_s8 }
   0x4   :  { %3699 = sst [smem:[#allocation27_spill]] %s3686_s9 }
   0x5   :  { %15 = vsyncpa [#allocation6], 0 }
   0x6   :  { %17 = vsyncpa [#allocation6 + $0x1], 0 }
   0x7   :  { %18 = vsyncpa [#allocation9], 0 }
   0x8   :  { %19 = vsyncpa [#allocation12], 0 }
   0x9   :  { %20 = vsyncpa [#allocation7], 0 }
   0xa   :  { %22 = vsyncpa [#allocation7 + $0x1], 0 }
   0xb   :  { %23 = vsyncpa [#allocation16], 0  ;;  %s3146_s30 = smov 0   ;;  %s3148_s10 = smov 0  }
   0xc   :  { %s3150_s11 = smov 0   ;;  %s3152_s12 = smov 0  }
   0xd   :  { %s3154_s13 = smov 0   ;;  %s3156_s14 = smov 0  }
   0xe LB: > { %3700 = sst [smem:[#allocation22_spill]] %s3056_s30  ;;  %s2186_s15 = sadd.s32 4294967295, %s3076_s14   ;;  %s3076_s14 = sphi %s3156_s14, %s29_s14   ;;  %s3072_s13 = sphi %s3154_s13, %s3728_s13   ;;  %s3068_s12 = sphi %s3152_s12, %s3727_s12   ;;  %s3064_s11 = sphi %s3150_s11, %s3726_s11   ;;  %s3060_s10 = sphi %s3148_s10, %s3725_s10   ;;  %s3056_s30 = sphi %s3146_s30, %s3724_s30  }
   0xf   : > { %s2187_s16 = sadd.s32 4294967294, %s3076_s14   ;;  %p63_p0 = scmp.ne.s32.totalorder %s3060_s10, %s3056_s30 }
  0x10   : > { %p3180_p1 = scmp.eq.s32.totalorder %s2186_s15, 0  ;;  %p3184_p2 = scmp.eq.s32.totalorder %s2186_s15, 1 }
  0x11   : > { %p247_p3 = scmp.eq.s32.totalorder %s2187_s16, 1  ;;  %p2188_p5 = scmp.ge.s32.totalorder %s3076_s14, 1 }
  0x12   : > { %s3701_s17 = scalar_select %p3180_p1, 1, 0 }
  0x13   : > { %s3702_s18 = scalar_select %p3184_p2, 1, 0 }
  0x14   : > { %p3190_p4 = por %p3180_p1, %p63_p0  ;;  %p3195_p6 = por %p247_p3, %p63_p0 }
  0x15   : > { %p280_p7 = scmp.lt.s32.totalorder %s3076_s14, 3  ;;  %s3078_s22 = smov [#allocation8]  }
  0x16   : > { %s3703_s19 = scalar_select %p3190_p4, 1, 0 }
  0x17   : > { %s3704_s20 = scalar_select %p3195_p6, 1, 0 }
  0x18   : > { %p3200_p8 = pnand %p2188_p5, %p280_p7  ;;  %s295_s23 = sshll.u32 %s3078_s22, 4  ;;  %s296_s23 = int_to_ptr.vmem [resolvable:$true] %s295_s23 }
  0x19   : > { %3705 = sst [smem:[#allocation23_spill]] %s3704_s20  ;;  %s3079_s25 = smov [#allocation11]  }
  0x1a   : > { %s3706_s21 = scalar_select %p3200_p8, 1, 0 }
  0x1b   : > { %p2563_p10 = pneg %p3200_p8  ;;  %s318_s26 = sshll.u32 %s3079_s25, 4  ;;  %s3213_s26 = int_to_ptr.vmem [resolvable:$true] %s318_s26 }
  0x1c   : > { %s3080_s27 = smov [#allocation10]   ;;  %s3708_s1 = sld [smem:[#allocation24_spill]] }
  0x1d   : > { %p3209_p11 = pnand %p2563_p10, %p3180_p1  ;;  %s3215_s28 = sshll.u32 %s3080_s27, 4  ;;  %s306_s28 = int_to_ptr.vmem [resolvable:$true] %s3215_s28 }
  0x1f   : > { %p3225_p13 = pneg %p3209_p11 }
  0x22   : > { %s2814_s16 = scalar_lea.hbm %s3708_s1, 128 }
  0x23   : > { %p2815_p12 = scmp.ne.s32.totalorder %s3708_s1, %s2814_s16  ;;  %p2821_p5 = scmp.lt.u32.totalorder %s2814_s16, %s3708_s1 }
  0x25   : > { %p2817_p0 = pnand %p3225_p13, %p2815_p12 }
  0x27   : > { %p2818_p3 = pneg %p2817_p0 }
  0x29   : > { %p2823_p7 = pnand %p2821_p5, %p2818_p3 }
  0x2b   : > { %2826 = shalt.err (!%p2823_p7)
}
  0x2c   : > { %s2827_s29 = scalar_lea.vmem %s296_s23, 128  ;;  %p2835_p1 = scmp.lt.s32.totalorder %s296_s23, %s296_s23 }
  0x2d   : > { %p2828_p10 = scmp.ne.s32.totalorder %s296_s23, %s2827_s29  ;;  %p2836_p4 = scmp.lt.s32.totalorder %s2827_s29, %s2827_s29 }
  0x2f   : > { %p2830_p9 = pnand %p2828_p10, %p3225_p13  ;;  %p2837_p8 = por %p2836_p4, %p2835_p1 }
  0x31   : > { %p2831_p6 = pneg %p2830_p9 }
  0x33   : > { %p2838_p2 = pnand %p2837_p8, %p2831_p6 }
  0x35   : > { %2841 = shalt.err (!%p2838_p2)
}
  0x36   : > { %2566 = dma.hbm_to_vmem [thread:$0]  (!%p3209_p11), %s3708_s1, 128, %s296_s23, [#allocation9]  }
  0x37   : > { %s3710_s3 = sld [smem:[#allocation25_spill]] }
  0x3d   : > { %s2842_s25 = scalar_lea.hbm %s3710_s3, 3072 }
  0x3e   : > { %p2843_p9 = scmp.ne.s32.totalorder %s3710_s3, %s2842_s25  ;;  %p2849_p2 = scmp.lt.u32.totalorder %s2842_s25, %s3710_s3 }
  0x40   : > { %p2845_p12 = pnand %p2843_p9, %p3225_p13 }
  0x42   : > { %p2846_p1 = pneg %p2845_p12 }
  0x44   : > { %p2851_p4 = pnand %p2849_p2, %p2846_p1 }
  0x46   : > { %2854 = shalt.err (!%p2851_p4)
}
  0x47   : > { %s2855_s23 = scalar_lea.vmem %s3213_s26, 3072  ;;  %p2863_p3 = scmp.lt.s32.totalorder %s3213_s26, %s3213_s26 }
  0x48   : > { %p2856_p6 = scmp.ne.s32.totalorder %s3213_s26, %s2855_s23  ;;  %p2864_p5 = scmp.lt.s32.totalorder %s2855_s23, %s2855_s23 }
  0x4a   : > { %p2858_p8 = pnand %p2856_p6, %p3225_p13  ;;  %p2865_p7 = por %p2864_p5, %p2863_p3 }
  0x4c   : > { %p2859_p0 = pneg %p2858_p8 }
  0x4e   : > { %p2866_p10 = pnand %p2865_p7, %p2859_p0 }
  0x50   : > { %2869 = shalt.err (!%p2866_p10)
}
  0x51   : > { %s3081_s9 = smov 192   ;;  %s3082_s8 = smov 12  }
  0x52   : > { %2572 = dma.hbm_to_vmem [thread:$0]  (!%p3209_p11), %s3710_s3, 3072, %s3213_s26, [#allocation12], %s3081_s9, %s3081_s9, %s3082_s8  }
  0x53   : > { %s2870_s25 = scalar_lea.hbm %s3679_s2, 3072 }
  0x54   : > { %p2871_p9 = scmp.ne.s32.totalorder %s3679_s2, %s2870_s25  ;;  %p2877_p2 = scmp.lt.u32.totalorder %s2870_s25, %s3679_s2 }
  0x56   : > { %p2873_p12 = pnand %p2871_p9, %p3225_p13 }
  0x58   : > { %p2874_p1 = pneg %p2873_p12 }
  0x5a   : > { %p2879_p4 = pnand %p2877_p2, %p2874_p1 }
  0x5c   : > { %2882 = shalt.err (!%p2879_p4)
}
  0x5d   : > { %s2883_s20 = scalar_lea.vmem %s306_s28, 3072  ;;  %p2891_p3 = scmp.lt.s32.totalorder %s306_s28, %s306_s28 }
  0x5e   : > { %p2884_p6 = scmp.ne.s32.totalorder %s306_s28, %s2883_s20  ;;  %p2892_p5 = scmp.lt.s32.totalorder %s2883_s20, %s2883_s20 }
  0x60   : > { %p2886_p8 = pnand %p2884_p6, %p3225_p13  ;;  %p2893_p7 = por %p2892_p5, %p2891_p3 }
  0x62   : > { %p2887_p0 = pneg %p2886_p8 }
  0x64   : > { %p2894_p10 = pnand %p2893_p7, %p2887_p0 }
  0x66   : > { %2897 = shalt.err (!%p2894_p10)
}
  0x67   : > { %2569 = dma.hbm_to_vmem [thread:$0]  (!%p3209_p11), %s3679_s2, 3072, %s306_s28, [#allocation9], %s3081_s9, %s3081_s9, %s3082_s8  }
  0x68   : > { %s3083_s1 = smov [#allocation13]   ;;  %s2898_s27 = scalar_lea.hbm %s3683_s6, 1024 }
  0x69   : > { %s337_s16 = sshll.u32 %s3083_s1, 4  ;;  %p2899_p9 = scmp.ne.s32.totalorder %s3683_s6, %s2898_s27  ;;  %s338_s16 = int_to_ptr.vmem [resolvable:$true] %s337_s16 }
  0x6a   : > { %p2905_p2 = scmp.lt.u32.totalorder %s2898_s27, %s3683_s6 }
  0x6b   : > { %p2901_p12 = pnand %p2899_p9, %p3225_p13 }
  0x6d   : > { %p2902_p1 = pneg %p2901_p12 }
  0x6f   : > { %p2907_p4 = pnand %p2905_p2, %p2902_p1 }
  0x71   : > { %2910 = shalt.err (!%p2907_p4)
}
  0x72   : > { %s2911_s28 = scalar_lea.vmem %s338_s16, 1024  ;;  %p2919_p3 = scmp.lt.s32.totalorder %s338_s16, %s338_s16 }
  0x73   : > { %p2912_p6 = scmp.ne.s32.totalorder %s338_s16, %s2911_s28  ;;  %p2920_p5 = scmp.lt.s32.totalorder %s2911_s28, %s2911_s28 }
  0x75   : > { %p2914_p8 = pnand %p2912_p6, %p3225_p13  ;;  %p2921_p7 = por %p2920_p5, %p2919_p3 }
  0x77   : > { %p2915_p0 = pneg %p2914_p8 }
  0x79   : > { %p2922_p10 = pnand %p2921_p7, %p2915_p0 }
  0x7b   : > { %2925 = shalt.err (!%p2922_p10)
}
  0x7c   : > { %s3084_s9 = smov 64   ;;  %s3085_s3 = smov 4  }
  0x7d   : > { %2575 = dma.hbm_to_vmem [thread:$0]  (!%p3209_p11), %s3683_s6, 1024, %s338_s16, [#allocation12], %s3084_s9, %s3084_s9, %s3085_s3  }
  0x7e   : > { %s38_s26 = sadd.s32 1, %s3072_s13  ;;  %s50_s15 = sadd.s32 1, %s3064_s11 }
  0x7f   : > { %p39_p13 = scmp.ge.s32.totalorder %s38_s26, 2  ;;  %p57_p9 = scmp.ne.s32.totalorder %s3064_s11, %s3060_s10 }
  0x80   : > { %p58_p12 = scmp.eq.s32.totalorder %s3076_s14, 0  ;;  %p2588_p1 = scmp.lt.s32.totalorder %s3076_s14, 2 }
  0x81   : > { %s3730_s26 = smov (%p39_p13, %s38_s26), 0  ;;  %p3711_p4 = scmp.ne.s32.totalorder %s3702_s18, 0 }
  0x82   : > { %p59_p2 = por %p58_p12, %p57_p9  ;;  %s45_s24 = ssub.s32 %s3072_s13, %s3730_s26 }
  0x83   : > { %p3311_p6 = por %p3711_p4, %p57_p9  ;;  %s354_s22 = sand.u32 1, %s3064_s11  }
  0x84   : > { %p48_p8 = scmp.eq.s32.totalorder %s45_s24, 0  ;;  %s2194_s16 = sshll.u32 %s354_s22, 5 }
  0x85   : > { %s2359_s25 = sshll.u32 %s3072_s13, 9  ;;  %s358_s28 = scalar_lea.vmem [#allocation5], %s2194_s16 }
  0x86   : > { %s3320_s27 = scalar_select %p48_p8, %s3064_s11, %s50_s15  }
  0x87   : > { %s3325_s20 = scalar_lea.hbm %s3677_s0, %s2359_s25  ;;  %s366_s9 = sshll.u32 %s358_s28, 4  ;;  %s3333_s9 = int_to_ptr.vmem [resolvable:$true] %s366_s9 }
  0x88   : > { %p3329_p11 = pnand %p2588_p1, %p59_p2  ;;  %s3335_s30 = scalar_lea.sflag [#allocation6], %s354_s22 }
  0x89   : > { %s2926_s8 = scalar_lea.hbm %s3325_s20, 512  ;;  %s2931_s16 = scalar_lea.hbm %s3677_s0, 1024 }
  0x8a   : > { %p2927_p0 = scmp.ne.s32.totalorder %s3325_s20, %s2926_s8  ;;  %p2928_p3 = pneg %p3329_p11 }
  0x8b   : > { %p2932_p10 = scmp.lt.u32.totalorder %s3325_s20, %s3677_s0  ;;  %p2933_p13 = scmp.lt.u32.totalorder %s2931_s16, %s2926_s8 }
  0x8c   : > { %p2929_p5 = pnand %p2928_p3, %p2927_p0  ;;  %p2935_p12 = scmp.lt.u32.totalorder %s2926_s8, %s3325_s20 }
  0x8d   : > { %p2934_p9 = por %p2933_p13, %p2932_p10 }
  0x8e   : > { %p2930_p7 = pneg %p2929_p5 }
  0x8f   : > { %p2936_p1 = por %p2935_p12, %p2934_p9 }
  0x91   : > { %p2937_p2 = pnand %p2936_p1, %p2930_p7 }
  0x93   : > { %2940 = shalt.err (!%p2937_p2)
}
  0x94   : > { %s2941_s22 = scalar_lea.vmem %s3333_s9, 512  ;;  %s3086_s23 = smov [#allocation5]  }
  0x95   : > { %p2942_p4 = scmp.ne.s32.totalorder %s3333_s9, %s2941_s22  ;;  %s2946_s28 = sshll.u32 %s3086_s23, 4  ;;  %s2947_s28 = int_to_ptr.vmem [resolvable:$false] %s2946_s28 }
  0x96   : > { %s2948_s15 = scalar_lea.vmem %s2947_s28, 1024  ;;  %p2949_p5 = scmp.lt.s32.totalorder %s3333_s9, %s2947_s28 }
  0x97   : > { %p2944_p8 = pnand %p2942_p4, %p2928_p3  ;;  %p2950_p10 = scmp.lt.s32.totalorder %s2948_s15, %s2941_s22 }
  0x99   : > { %p2945_p0 = pneg %p2944_p8  ;;  %p2951_p13 = por %p2950_p10, %p2949_p5 }
  0x9b   : > { %p2952_p9 = pnand %p2951_p13, %p2945_p0 }
  0x9d   : > { %2955 = shalt.err (!%p2952_p9)
}
  0x9e   : > { %s3087_s8 = smov 128   ;;  %s3088_s24 = smov 8  }
  0x9f   : > { %2579 = dma.hbm_to_vmem [thread:$0]  (!%p3329_p11), %s3325_s20, 512, %s3333_s9, %s3335_s30, %s3087_s8, %s3087_s8, %s3088_s24  }
  0xa0   : > { %p3714_p3 = scmp.ne.s32.totalorder %s3706_s21, 0 }
  0xa1   : > { %s3366_s16 = sand.u32 (!%p3714_p3), 1, %s3060_s10   ;;  %p3715_p7 = scmp.ne.s32.totalorder (!%p3714_p3), %s3703_s19, 0 }
  0xa2   : > { %378 = sbr.rel (%p3714_p3) target bundleno = 1603 (0x643), region = 52  ;;  %s2198_s25 = sshll.u32 (!%p3714_p3), %s3366_s16, 5 }
  0xa3   : > { %s381_s29 = scalar_lea.sflag (!%p3714_p3), [#allocation6], %s3366_s16  ;;  %s3370_s22 = scalar_lea.vmem (!%p3714_p3), [#allocation5], %s2198_s25 }
  0xa9   : > { %3035 = dma.done.wait (%p3715_p7), %s381_s29, 512  }
  0xaa   : > { %3037 = vsyncadd (%p3715_p7), %s381_s29, 4294966784  ;;  %p3716_p11 = scmp.ne.s32.totalorder %s3701_s17, 0 }
  0xac   : > { %3039 = dma.done.wait (%p3716_p11), [#allocation9], 3200  }
  0xad   : > { %3041 = vsyncadd (%p3716_p11), [#allocation9], 4294964096 }
  0xae   : > { %3043 = dma.done.wait (%p3716_p11), [#allocation12], 4096  }
  0xaf   : > { %3045 = vsyncadd (%p3716_p11), [#allocation12], 4294963200  ;;  %s3384_s21 = scalar_lea.vmem [#allocation14], %s2198_s25  ;;  %p2204_p12 = scmp.ne.s32.totalorder %s3068_s12, 0 }
  0xb0   : > { %v442_v0 = vld [vmem:[#allocation8] sm:$0xff] (!%p2204_p12) }
  0xb1   : > { %441 = sbr.rel (%p2204_p12) target bundleno = 184 (0xb8), region = 76  ;;  %443 = vst [vmem:[#allocation4] sm:$0xff] (!%p2204_p12), %v442_v0 }
  0xb8 PF: > { %v2660_v1 = vld [vmem:[#allocation10 + $0x4] ss:$12 sps:$4 sm:$0xff]   ;;  %v2662_v2 = vld [vmem:[#allocation10] ss:$12 sps:$4 sm:$0xff]   ;;  %v3089_v3 = vmov 0   ;;  %v444_v14 = vld [vmem:[%s3370_s22] sm:$0xff] }
  0xb9   : > { %673 = vmatprep.mubr.bf16.mxu0 %v3089_v3  ;;  %641 = vmatprep.subr.bf16.mxu0 %v2660_v1  ;;  %v2663_v4 = vld [vmem:[#allocation10 + $0x1c] ss:$12 sps:$4 sm:$0xff]   ;;  %v2665_v5 = vld [vmem:[#allocation10 + $0x18] ss:$12 sps:$4 sm:$0xff]   ;;  %v2666_v6 = vld [vmem:[#allocation10 + $0x34] ss:$12 sps:$4 sm:$0xff]  }
  0xba   : > { %642 = vmatpush1.bf16.msra.mxu0 %v2662_v2  ;;  %v2668_v7 = vld [vmem:[#allocation10 + $0x30] ss:$12 sps:$4 sm:$0xff]   ;;  %v2669_v8 = vld [vmem:[#allocation10 + $0x4c] ss:$12 sps:$4 sm:$0xff]   ;;  %v2678_v9 = vld [vmem:[#allocation10 + $0x8] ss:$12 sps:$4 sm:$0xff]  }
  0xbb   : > { %643 = vmatprep.subr.bf16.mxu0 %v2663_v4  ;;  %v2671_v10 = vld [vmem:[#allocation10 + $0x48] ss:$12 sps:$4 sm:$0xff]   ;;  %2419 = vmatprep.subr.bf16.mxu1 %v2678_v9  ;;  %v2682_v11 = vld [vmem:[#allocation10 + $0x20] ss:$12 sps:$4 sm:$0xff]   ;;  %v2672_v12 = vld [vmem:[#allocation10 + $0x64] ss:$12 sps:$4 sm:$0xff]   ;;  %v486_v4 = vlaneseq }
  0xbc   : > { %2420 = vmatpush3.bf16.msra.mxu1 %v2678_v9  ;;  %v2686_v13 = vld [vmem:[#allocation10 + $0x38] ss:$12 sps:$4 sm:$0xff]   ;;  %v2674_v16 = vld [vmem:[#allocation10 + $0x60] ss:$12 sps:$4 sm:$0xff]   ;;  %v2675_v17 = vld [vmem:[#allocation10 + $0x7c] ss:$12 sps:$4 sm:$0xff]  }
  0xbd   : > { %2421 = vmatprep.subr.bf16.mxu1 %v2682_v11  ;;  %v445_v15 = vld [vmem:[%s3370_s22 + $0x8] sm:$0xff]  ;;  %v2690_v19 = vld [vmem:[#allocation10 + $0x50] ss:$12 sps:$4 sm:$0xff]   ;;  %v2694_v22 = vld [vmem:[#allocation10 + $0x68] ss:$12 sps:$4 sm:$0xff]   ;;  %v3090_v40 = vmov 0.0  }
  0xbe   : > { %644 = vmatpush1.bf16.msra.mxu0 %v2665_v5  ;;  %v2360_v18 = vpack.c.bf16 %v445_v15, %v444_v14  ;;  %v2677_v20 = vld [vmem:[#allocation10 + $0x78] ss:$12 sps:$4 sm:$0xff]   ;;  %v2679_v21 = vld [vmem:[#allocation10 + $0x94] ss:$12 sps:$4 sm:$0xff]   ;;  %v2681_v23 = vld [vmem:[#allocation10 + $0x90] ss:$12 sps:$4 sm:$0xff]  }
  0xbf   : > { %645 = vmatprep.subr.bf16.mxu0 %v2666_v6  ;;  %v2683_v24 = vld [vmem:[#allocation10 + $0xac] ss:$12 sps:$4 sm:$0xff]   ;;  %v2685_v26 = vld [vmem:[#allocation10 + $0xa8] ss:$12 sps:$4 sm:$0xff]   ;;  %v3390_v27 = vld [vmem:[#allocation11 + $0x4] ss:$12 sps:$4 sm:$0xff]  }
  0xc0   : > { %2422 = vmatpush3.bf16.msra.mxu1 %v2682_v11  ;;  %2435 = vmatprep.mubr.bf16.mxu1 %v2360_v18  ;;  %v2698_v25 = vld [vmem:[#allocation10 + $0x80] ss:$12 sps:$4 sm:$0xff]   ;;  %v2702_v28 = vld [vmem:[#allocation10 + $0x98] ss:$12 sps:$4 sm:$0xff]   ;;  %v3395_v30 = vld [vmem:[#allocation11 + $0x1c] ss:$12 sps:$4 sm:$0xff]  }
  0xc1   : > { %2423 = vmatprep.subr.bf16.mxu1 %v2686_v13  ;;  %v3392_v29 = vld [vmem:[#allocation11] ss:$12 sps:$4 sm:$0xff]   ;;  %v2706_v31 = vld [vmem:[#allocation10 + $0xb0] ss:$12 sps:$4 sm:$0xff]   ;;  %v3397_v32 = vld [vmem:[#allocation11 + $0x18] ss:$12 sps:$4 sm:$0xff]  }
  0xc2   : > { %646 = vmatpush1.bf16.msra.mxu0 %v2668_v7  ;;  %v446_v33 = vld [vmem:[%s3370_s22 + $0x10] sm:$0xff]  ;;  %v447_v34 = vld [vmem:[%s3370_s22 + $0x18] sm:$0xff]  ;;  %v2718_v45 = vld [vmem:[#allocation11 + $0x38] ss:$12 sps:$4 sm:$0xff]   ;;  %vm3091_vm0 = vmmov 0   ;;  %v487_v5 = vshrl.u32 %v486_v4, 7 }
  0xc3   : > { %647 = vmatprep.subr.bf16.mxu0 %v2669_v8  ;;  %v3403_v35 = vld [vmem:[#allocation11 + $0x34] ss:$12 sps:$4 sm:$0xff]   ;;  %v3405_v36 = vld [vmem:[#allocation11 + $0x30] ss:$12 sps:$4 sm:$0xff]   ;;  %v3408_v37 = vld [vmem:[#allocation11 + $0x4c] ss:$12 sps:$4 sm:$0xff]   ;;  %v2361_v38 = vpack.c.bf16 %v447_v34, %v446_v33 }
  0xc4   : > { %2424 = vmatpush3.bf16.msra.mxu1 %v2686_v13  ;;  %v2713_v39 = vld [vmem:[#allocation11 + $0x8] ss:$12 sps:$4 sm:$0xff]   ;;  %v2717_v42 = vld [vmem:[#allocation11 + $0x20] ss:$12 sps:$4 sm:$0xff]   ;;  %v3415_v43 = vld [vmem:[#allocation11 + $0x64] ss:$12 sps:$4 sm:$0xff]  }
  0xc5   : > { %2425 = vmatprep.subr.bf16.mxu1 %v2690_v19  ;;  %v3413_v41 = vld [vmem:[#allocation11 + $0x48] ss:$12 sps:$4 sm:$0xff]   ;;  %v3420_v44 = vld [vmem:[#allocation11 + $0x60] ss:$12 sps:$4 sm:$0xff]   ;;  %v3430_v47 = vld [vmem:[#allocation11 + $0x78] ss:$12 sps:$4 sm:$0xff]  }
  0xc6   : > { %648 = vmatpush1.bf16.msra.mxu0 %v2671_v10  ;;  %v3425_v46 = vld [vmem:[#allocation11 + $0x7c] ss:$12 sps:$4 sm:$0xff]   ;;  %v3432_v49 = vld [vmem:[#allocation11 + $0x94] ss:$12 sps:$4 sm:$0xff]   ;;  %v3439_v52 = vld [vmem:[#allocation11 + $0xac] ss:$12 sps:$4 sm:$0xff]  }
  0xc7   : > { %649 = vmatprep.subr.bf16.mxu0 %v2672_v12  ;;  %v2719_v48 = vld [vmem:[#allocation11 + $0x50] ss:$12 sps:$4 sm:$0xff]   ;;  %v2720_v51 = vld [vmem:[#allocation11 + $0x68] ss:$12 sps:$4 sm:$0xff]   ;;  %v2721_v55 = vld [vmem:[#allocation11 + $0x80] ss:$12 sps:$4 sm:$0xff]  }
  0xc8   : > { %2426 = vmatpush3.bf16.msra.mxu1 %v2690_v19  ;;  %v3437_v50 = vld [vmem:[#allocation11 + $0x90] ss:$12 sps:$4 sm:$0xff]   ;;  %v3444_v53 = vld [vmem:[#allocation11 + $0xa8] ss:$12 sps:$4 sm:$0xff]   ;;  %v2722_v57 = vld [vmem:[#allocation11 + $0x98] ss:$12 sps:$4 sm:$0xff]  }
  0xc9   : > { %2427 = vmatprep.subr.bf16.mxu1 %v2694_v22  ;;  %v3446_v54 = vld [vmem:[#allocation4] sm:$0xff]  ;;  %v2725_v60 = vld [vmem:[#allocation11 + $0x20] ss:$12 sps:$4 sm:$0xff]   ;;  %v2726_v61 = vld [vmem:[#allocation11 + $0x38] ss:$12 sps:$4 sm:$0xff]   ;;  %v488_v6 = vsub.s32 0, %v487_v5 }
  0xca   : > { %650 = vmatpush1.bf16.msra.mxu0 %v2674_v16  ;;  %v763_v56 = vpack.c.bf16 %v3446_v54, %v3446_v54  ;;  %v2723_v58 = vld [vmem:[#allocation11 + $0xb0] ss:$12 sps:$4 sm:$0xff]   ;;  %v2724_v59 = vld [vmem:[#allocation11 + $0x8] ss:$12 sps:$4 sm:$0xff]   ;;  %v2729_v0 = vld [vmem:[#allocation11 + $0x80] ss:$12 sps:$4 sm:$0xff]  }
  0xcb   : > { %651 = vmatprep.subr.bf16.mxu0 %v2675_v17  ;;  %v2727_v62 = vld [vmem:[#allocation11 + $0x50] ss:$12 sps:$4 sm:$0xff]   ;;  %v2728_v63 = vld [vmem:[#allocation11 + $0x68] ss:$12 sps:$4 sm:$0xff]   ;;  %v2730_v1 = vld [vmem:[#allocation11 + $0x98] ss:$12 sps:$4 sm:$0xff]  }
  0xcc   : > { %2428 = vmatpush3.bf16.msra.mxu1 %v2694_v22  ;;  %v2731_v2 = vld [vmem:[#allocation11 + $0xb0] ss:$12 sps:$4 sm:$0xff]   ;;  %v484_v7 = vld [vmem:[%s3681_s4] sm:$0x7]  ;;  %v492_v8 = vsub.s32 1, %v487_v5  ;;  %v496_v12 = vsub.s32 2, %v487_v5 }
  0xcd   : > { %2429 = vmatprep.subr.bf16.mxu1 %v2698_v25  ;;  %v489_v9 = vrot.slane %v484_v7, %v488_v6  ;;  %v3509_v6 = vld [vmem:[%s3682_s5] ss:$0 sm:$0xff]  ;;  %p2351_p1 = scmp.ne.s32.totalorder %s3068_s12, 1 }
  0xce   : > { %652 = vmatpush1.bf16.msra.mxu0 %v2677_v20  ;;  %v493_v13 = vrot.slane %v484_v7, %v492_v8 }
  0xcf   : > { %653 = vmatprep.subr.bf16.mxu0 %v2679_v21 }
  0xd0   : > { %2430 = vmatpush3.bf16.msra.mxu1 %v2698_v25 }
  0xd1   : > { %2431 = vmatprep.subr.bf16.mxu1 %v2702_v28 }
  0xd2   : > { %654 = vmatpush1.bf16.msra.mxu0 %v2681_v23 }
  0xd3   : > { %655 = vmatprep.subr.bf16.mxu0 %v2683_v24 }
  0xd4   : > { %2432 = vmatpush3.bf16.msra.mxu1 %v2702_v28 }
  0xd5   : > { %2433 = vmatprep.subr.bf16.mxu1 %v2706_v31 }
  0xd6   : > { %656 = vmatpush1.bf16.msra.mxu0 %v2685_v26 }
  0xd7   : > { %924 = vmatprep.subr.bf16.mxu0 %v3390_v27 }
  0xd8   : > { %2434 = vmatpush3.bf16.msra.mxu1 %v2706_v31 }
  0xd9   : > { %674 = vmatmul.mubr.bf16.vlgmr.msra.gmra.mrb[0].mxu0 %v2360_v18  ;;  %2439 = vmatprep.subr.bf16.mxu1 %v3090_v40  ;;  %v497_v18 = vrot.slane %v484_v7, %v496_v12 }
  0xda   : > { %925 = vmatpush1.bf16.msra.mxu0 %v3392_v29  ;;  %683 = vmatprep.mubr.bf16.mxu0 %v3089_v3 }
  0xdb   : > { %926 = vmatprep.subr.bf16.mxu0 %v3395_v30  ;;  %2436 = vmatmul.mubr.bf16.vlgmr.msra.gmra.mrb[0].mxu1 %v2361_v38 }
  0xdc   : > { %2440 = vmatpush3.bf16.msra.mxu1 %v2713_v39  ;;  %2455 = vmatprep.mubr.msk.bf16.mxu1 %vm3091_vm0, %v3090_v40 }
  0xdd   : > { %2441 = vmatprep.subr.bf16.mxu1 %v3090_v40 }
  0xde   : > { %927 = vmatpush1.bf16.msra.mxu0 %v3397_v32 }
  0xdf   : > { %928 = vmatprep.subr.bf16.mxu0 %v3403_v35 }
  0xe0   : > { %2442 = vmatpush3.bf16.msra.mxu1 %v2717_v42 }
  0xe1   : > { %684 = vmatmul.mubr.bf16.gmra.mrb[4].mxu0 %v2361_v38  ;;  %2443 = vmatprep.subr.bf16.mxu1 %v3090_v40 }
  0xe2   : > { %929 = vmatpush1.bf16.msra.mxu0 %v3405_v36  ;;  %956 = vmatprep.mubr.bf16.mxu0 %v3089_v3 }
  0xe3   : > { %930 = vmatprep.subr.bf16.mxu0 %v3408_v37 }
  0xe4   : > { %2444 = vmatpush3.bf16.msra.mxu1 %v2718_v45 }
  0xe5   : > { %2445 = vmatprep.subr.bf16.mxu1 %v3090_v40 }
  0xe6   : > { %931 = vmatpush1.bf16.msra.mxu0 %v3413_v41 }
  0xe7   : > { %932 = vmatprep.subr.bf16.mxu0 %v3415_v43 }
  0xe8   : > { %2446 = vmatpush3.bf16.msra.mxu1 %v2719_v48 }
  0xe9   : > { %2447 = vmatprep.subr.bf16.mxu1 %v3090_v40 }
  0xea   : > { %933 = vmatpush1.bf16.msra.mxu0 %v3420_v44 }
  0xeb   : > { %934 = vmatprep.subr.bf16.mxu0 %v3425_v46 }
  0xec   : > { %2448 = vmatpush3.bf16.msra.mxu1 %v2720_v51 }
  0xed   : > { %2449 = vmatprep.subr.bf16.mxu1 %v3090_v40 }
  0xee   : > { %935 = vmatpush1.bf16.msra.mxu0 %v3430_v47 }
  0xef   : > { %936 = vmatprep.subr.bf16.mxu0 %v3432_v49 }
  0xf0   : > { %2450 = vmatpush3.bf16.msra.mxu1 %v2721_v55 }
  0xf1   : > { %2451 = vmatprep.subr.bf16.mxu1 %v3090_v40 }
  0xf2   : > { %937 = vmatpush1.bf16.msra.mxu0 %v3437_v50 }
  0xf3   : > { %938 = vmatprep.subr.bf16.mxu0 %v3439_v52 }
  0xf4   : > { %2452 = vmatpush3.bf16.msra.mxu1 %v2722_v57 }
  0xf5   : > { %2453 = vmatprep.subr.bf16.mxu1 %v3090_v40 }
  0xf6   : > { %939 = vmatpush1.bf16.msra.mxu0 %v3444_v53 }
  0xf7   : > { %1192 = vmatprep.subr.bf16.mxu0 %v3390_v27 }
  0xf8   : > { %2454 = vmatpush3.bf16.msra.mxu1 %v2723_v58 }
  0xf9   : > { %957 = vmatmul.mubr.bf16.vlgmr.msra.gmra.mrb[8].mxu0 %v763_v56  ;;  %2459 = vmatprep.subr.bf16.mxu1 %v3090_v40 }
  0xfa   : > { %1193 = vmatpush1.bf16.msra.mxu0 %v3392_v29  ;;  %1224 = vmatprep.mubr.bf16.mxu0 %v3089_v3 }
  0xfb   : > { %1194 = vmatprep.subr.bf16.mxu0 %v3395_v30  ;;  %2456 = vmatmul.mubr.bf16.vlgmr.msra.gmra.mrb[4].mxu1 %v763_v56 }
  0xfc   : > { %2475 = vmatprep.mubr.msk.bf16.mxu1 %vm3091_vm0, %v3090_v40  ;;  %2460 = vmatpush3.bf16.msra.mxu1 %v2724_v59 }
  0xfd   : > { %2461 = vmatprep.subr.bf16.mxu1 %v3090_v40 }
  0xfe   : > { %1195 = vmatpush1.bf16.msra.mxu0 %v3397_v32 }
  0xff   : > { %1196 = vmatprep.subr.bf16.mxu0 %v3403_v35 }
 0x100   : > { %2462 = vmatpush3.bf16.msra.mxu1 %v2725_v60 }
 0x101   : > { %2463 = vmatprep.subr.bf16.mxu1 %v3090_v40 }
 0x102   : > { %1197 = vmatpush1.bf16.msra.mxu0 %v3405_v36 }
 0x103   : > { %1198 = vmatprep.subr.bf16.mxu0 %v3408_v37 }
 0x104   : > { %2464 = vmatpush3.bf16.msra.mxu1 %v2726_v61 }
 0x105   : > { %2465 = vmatprep.subr.bf16.mxu1 %v3090_v40 }
 0x106   : > { %1199 = vmatpush1.bf16.msra.mxu0 %v3413_v41 }
 0x107   : > { %1200 = vmatprep.subr.bf16.mxu0 %v3415_v43 }
 0x108   : > { %2466 = vmatpush3.bf16.msra.mxu1 %v2727_v62 }
 0x109   : > { %2467 = vmatprep.subr.bf16.mxu1 %v3090_v40 }
 0x10a   : > { %1201 = vmatpush1.bf16.msra.mxu0 %v3420_v44 }
 0x10b   : > { %1202 = vmatprep.subr.bf16.mxu0 %v3425_v46 }
 0x10c   : > { %2468 = vmatpush3.bf16.msra.mxu1 %v2728_v63 }
 0x10d   : > { %2469 = vmatprep.subr.bf16.mxu1 %v3090_v40 }
 0x10e   : > { %1203 = vmatpush1.bf16.msra.mxu0 %v3430_v47 }
 0x10f   : > { %1204 = vmatprep.subr.bf16.mxu0 %v3432_v49 }
 0x110   : > { %2470 = vmatpush3.bf16.msra.mxu1 %v2729_v0 }
 0x111   : > { %2471 = vmatprep.subr.bf16.mxu1 %v3090_v40 }
 0x112   : > { %1205 = vmatpush1.bf16.msra.mxu0 %v3437_v50 }
 0x113   : > { %1206 = vmatprep.subr.bf16.mxu0 %v3439_v52 }
 0x114   : > { %2472 = vmatpush3.bf16.msra.mxu1 %v2730_v1 }
 0x115   : > { %2473 = vmatprep.subr.bf16.mxu1 %v3090_v40 }
 0x116   : > { %1207 = vmatpush1.bf16.msra.mxu0 %v3444_v53 }
 0x117   : > { %1462 = vmatprep.subr.bf16.mxu0 %v3390_v27 }
 0x118   : > { %2474 = vmatpush3.bf16.msra.mxu1 %v2731_v2 }
 0x119   : > { %2479 = vmatprep.subr.bf16.mxu1 %v3090_v40 }
 0x1ac   : > { %v675_v10 = vpop.f32.mrb[0].mxu0 }
 0x1ad   : > { %v677_v11 = vpop.f32.mrb[1].mxu0  ;;  %v676_v45 = vadd.f32 %v675_v10, %v489_v9 }
 0x1ae   : > { %v679_v14 = vpop.f32.mrb[2].mxu0  ;;  %v2437_v20 = vpop.f32.mrb[0].mxu1  ;;  %v678_v48 = vadd.f32 %v677_v11, %v493_v13 }
 0x1af   : > { %v3488_v15 = vadd.f32 %v679_v14, %v489_v9  ;;  %v681_v16 = vpop.f32.mrb[3].mxu0  ;;  %v3494_v23 = vadd.f32 %v2437_v20, %v497_v18  ;;  %v728_v24 = vpop.f32.mrb[1].mxu1 }
 0x1b0   : > { %v3490_v17 = vadd.f32 %v681_v16, %v493_v13  ;;  %v2438_v28 = vpop.f32.mrb[2].mxu1  ;;  %v729_v10 = vadd.f32 %v728_v24, %v497_v18  ;;  %v2734_v24 = vld [vmem:[#allocation11 + $0x38] ss:$12 sps:$4 sm:$0xff]  }
 0x1b1   : > { %v3500_v34 = vadd.f32 %v2438_v28, %v497_v18  ;;  %v731_v38 = vpop.f32.mrb[3].mxu1  ;;  %v2735_v28 = vld [vmem:[#allocation11 + $0x50] ss:$12 sps:$4 sm:$0xff]  }
 0x1b2   : > { %v3504_v42 = vadd.f32 %v731_v38, %v497_v18  ;;  %v2733_v18 = vld [vmem:[#allocation11 + $0x20] ss:$12 sps:$4 sm:$0xff]  }
 0x1b3   : > { %v2737_v38 = vld [vmem:[#allocation11 + $0x80] ss:$12 sps:$4 sm:$0xff]  }
 0x1b4   : > { %v685_v19 = vpop.f32.mrb[4].mxu0 }
 0x1b5   : > { %v3492_v21 = vadd.f32 %v685_v19, %v489_v9  ;;  %v687_v22 = vpop.f32.mrb[5].mxu0 }
 0x1b6   : > { %v3496_v25 = vadd.f32 %v687_v22, %v493_v13  ;;  %v689_v26 = vpop.f32.mrb[6].mxu0 }
 0x1b7   : > { %v3498_v31 = vadd.f32 %v689_v26, %v489_v9  ;;  %v691_v33 = vpop.f32.mrb[7].mxu0 }
 0x1b8   : > { %v3502_v39 = vadd.f32 %v691_v33, %v493_v13  ;;  %v2736_v33 = vld [vmem:[#allocation11 + $0x68] ss:$12 sps:$4 sm:$0xff]  }
 0x1cc   : > { %v958_v51 = vpop.f32.mrb[8].mxu0 }
 0x1cd   : > { %v1008_v55 = vadd.f32 %v958_v51, %v676_v45  ;;  %v960_v56 = vpop.f32.mrb[9].mxu0  ;;  %v2739_v45 = vld [vmem:[#allocation11 + $0xb0] ss:$12 sps:$4 sm:$0xff]  }
 0x1ce   : > { %v1015_v57 = vadd.f32 %v960_v56, %v678_v48  ;;  %v962_v58 = vpop.f32.mrb[10].mxu0  ;;  %v999_v62 = vpop.f32.mrb[4].mxu1 }
 0x1cf   : > { %v2256_v59 = vmul.f32 -1.442695, %v1008_v55  ;;  %v963_v60 = vpop.f32.mrb[11].mxu0  ;;  %v2457_v63 = vpop.f32.mrb[5].mxu1  ;;  %v1022_v8 = vadd.f32 %v3509_v6, %v999_v62 }
 0x1d0   : > { %v2257_v61 = vmul.f32 -1.442695, %v1015_v57  ;;  %v1002_v0 = vpop.f32.mrb[6].mxu1 }
 0x1d1   : > { %2758 = vpow2.f32 %v2256_v59  ;;  %v2458_v1 = vpop.f32.mrb[7].mxu1 }
 0x1d2   : > { %2760 = vpow2.f32 %v2257_v61 }
 0x1db   : > { %v2759_v2 = vpop.eup %2758 }
 0x1dc   : > { %v1012_v4 = vadd.f32 1.0, %v2759_v2  ;;  %v2761_v5 = vpop.eup %2760 }
 0x1dd   : > { %v1019_v7 = vadd.f32 1.0, %v2761_v5 }
 0x1de   : > { %2762 = vrcp.f32 %v1012_v4 }
 0x1df   : > { %2764 = vrcp.f32 %v1019_v7 }
 0x1e8   : > { %v2763_v9 = vpop.eup %2762 }
 0x1e9   : > { %v1023_v11 = vmul.f32 %v2763_v9, %v1022_v8  ;;  %v2765_v13 = vpop.eup %2764 }
 0x1ea   : > { %v1026_v14 = vsub.f32 1.0, %v2765_v13  ;;  %v1028_v20 = vmul.f32 %v2765_v13, %v3446_v54  ;;  %v2732_v54 = vld [vmem:[#allocation11 + $0x8] ss:$12 sps:$4 sm:$0xff]  }
 0x1eb   : > { %v1024_v12 = vadd.f32 %v1023_v11, %v729_v10 }
 0x1ed   : > { %2766 = vtanh.f32 %v1024_v12 }
 0x1f7   : > { %v2767_v16 = vpop.eup %2766 }
 0x1f8   : > { %v1027_v19 = vmul.f32 %v2767_v16, %v1026_v14 }
 0x1fa   : > { %v3513_v22 = vadd.f32 %v1028_v20, %v1027_v19 }
 0x1fc   : > { %v1030_v26 = vpack.c.bf16 %v3513_v22, %v3513_v22 }
 0x1fe   : > { %1031 = vst [vmem:[#allocation3] sm:$0xf] %v1030_v26  ;;  %1225 = vmatmul.mubr.bf16.vlgmr.msra.gmra.mrb[12].mxu0 %v1030_v26  ;;  %2476 = vmatmul.mubr.bf16.vlgmr.msra.gmra.mrb[8].mxu1 %v1030_v26 }
 0x1ff   : > { %1463 = vmatpush1.bf16.msra.mxu0 %v3392_v29  ;;  %1494 = vmatprep.mubr.bf16.mxu0 %v3089_v3 }
 0x200   : > { %1464 = vmatprep.subr.bf16.mxu0 %v3395_v30  ;;  %2495 = vmatprep.mubr.msk.bf16.mxu1 %vm3091_vm0, %v3090_v40 }
 0x201   : > { %2480 = vmatpush3.bf16.msra.mxu1 %v2732_v54 }
 0x202   : > { %2481 = vmatprep.subr.bf16.mxu1 %v3090_v40 }
 0x203   : > { %1465 = vmatpush1.bf16.msra.mxu0 %v3397_v32 }
 0x204   : > { %1466 = vmatprep.subr.bf16.mxu0 %v3403_v35 }
 0x205   : > { %2482 = vmatpush3.bf16.msra.mxu1 %v2733_v18 }
 0x206   : > { %2483 = vmatprep.subr.bf16.mxu1 %v3090_v40 }
 0x207   : > { %1467 = vmatpush1.bf16.msra.mxu0 %v3405_v36 }
 0x208   : > { %1468 = vmatprep.subr.bf16.mxu0 %v3408_v37 }
 0x209   : > { %2484 = vmatpush3.bf16.msra.mxu1 %v2734_v24 }
 0x20a   : > { %2485 = vmatprep.subr.bf16.mxu1 %v3090_v40 }
 0x20b   : > { %1469 = vmatpush1.bf16.msra.mxu0 %v3413_v41 }
 0x20c   : > { %1470 = vmatprep.subr.bf16.mxu0 %v3415_v43 }
 0x20d   : > { %2486 = vmatpush3.bf16.msra.mxu1 %v2735_v28 }
 0x20e   : > { %2487 = vmatprep.subr.bf16.mxu1 %v3090_v40 }
 0x20f   : > { %1471 = vmatpush1.bf16.msra.mxu0 %v3420_v44 }
 0x210   : > { %1472 = vmatprep.subr.bf16.mxu0 %v3425_v46 }
 0x211   : > { %2488 = vmatpush3.bf16.msra.mxu1 %v2736_v33 }
 0x212   : > { %2489 = vmatprep.subr.bf16.mxu1 %v3090_v40 }
 0x213   : > { %1473 = vmatpush1.bf16.msra.mxu0 %v3430_v47 }
 0x214   : > { %1474 = vmatprep.subr.bf16.mxu0 %v3432_v49 }
 0x215   : > { %2490 = vmatpush3.bf16.msra.mxu1 %v2737_v38 }
 0x216   : > { %2491 = vmatprep.subr.bf16.mxu1 %v3090_v40 }
 0x217   : > { %1475 = vmatpush1.bf16.msra.mxu0 %v3437_v50 }
 0x218   : > { %1476 = vmatprep.subr.bf16.mxu0 %v3439_v52 }
 0x21b   : > { %1477 = vmatpush1.bf16.msra.mxu0 %v3444_v53 }
 0x21c   : > { %1732 = vmatprep.subr.bf16.mxu0 %v3390_v27  ;;  %v2738_v27 = vld [vmem:[#allocation11 + $0x98] ss:$12 sps:$4 sm:$0xff]  }
 0x21d   : > { %2492 = vmatpush3.bf16.msra.mxu1 %v2738_v27 }
 0x21e   : > { %2493 = vmatprep.subr.bf16.mxu1 %v3090_v40 }
 0x221   : > { %2494 = vmatpush3.bf16.msra.mxu1 %v2739_v45 }
 0x222   : > { %2499 = vmatprep.subr.bf16.mxu1 %v3090_v40 }
 0x2d1   : > { %v1226_v48 = vpop.f32.mrb[12].mxu0  ;;  %v1267_v51 = vpop.f32.mrb[8].mxu1 }
 0x2d2   : > { %v1277_v55 = vadd.f32 %v1226_v48, %v3488_v15  ;;  %v1228_v56 = vpop.f32.mrb[13].mxu0  ;;  %v2477_v57 = vpop.f32.mrb[9].mxu1  ;;  %v1291_v7 = vadd.f32 %v3509_v6, %v1267_v51 }
 0x2d3   : > { %v1284_v58 = vadd.f32 %v1228_v56, %v3490_v17  ;;  %v1230_v59 = vpop.f32.mrb[14].mxu0  ;;  %v1270_v60 = vpop.f32.mrb[10].mxu1  ;;  %v2749_v57 = vld [vmem:[#allocation13] sm:$0xff]  }
 0x2d4   : > { %v2282_v61 = vmul.f32 -1.442695, %v1277_v55  ;;  %v1231_v62 = vpop.f32.mrb[15].mxu0  ;;  %v2478_v63 = vpop.f32.mrb[11].mxu1  ;;  %v2752_v59 = vld [vmem:[#allocation13 + $0x18] sm:$0xff]   ;;  %v2753_v60 = vld [vmem:[#allocation13 + $0x20] sm:$0xff]  }
 0x2d5   : > { %v2283_v0 = vmul.f32 -1.442695, %v1284_v58  ;;  %v2750_v58 = vld [vmem:[#allocation13 + $0x8] sm:$0xff]   ;;  %v2755_v62 = vld [vmem:[#allocation13 + $0x30] sm:$0xff]   ;;  %v2756_v63 = vld [vmem:[#allocation13 + $0x38] sm:$0xff]  }
 0x2d6   : > { %2768 = vpow2.f32 %v2282_v61  ;;  %v2754_v61 = vld [vmem:[#allocation13 + $0x28] sm:$0xff]  }
 0x2d7   : > { %2770 = vpow2.f32 %v2283_v0 }
 0x2e0   : > { %v2769_v1 = vpop.eup %2768 }
 0x2e1   : > { %v1281_v2 = vadd.f32 1.0, %v2769_v1  ;;  %v2771_v4 = vpop.eup %2770 }
 0x2e2   : > { %v1288_v5 = vadd.f32 1.0, %v2771_v4 }
 0x2e3   : > { %2772 = vrcp.f32 %v1281_v2 }
 0x2e4   : > { %2774 = vrcp.f32 %v1288_v5 }
 0x2ed   : > { %v2773_v15 = vpop.eup %2772 }
 0x2ee   : > { %v1292_v8 = vmul.f32 %v2773_v15, %v1291_v7  ;;  %v2775_v9 = vpop.eup %2774 }
 0x2ef   : > { %v1295_v10 = vsub.f32 1.0, %v2775_v9  ;;  %v1297_v13 = vmul.f32 %v2775_v9, %v3513_v22 }
 0x2f0   : > { %v1293_v17 = vadd.f32 %v1292_v8, %v3504_v42 }
 0x2f2   : > { %2776 = vtanh.f32 %v1293_v17 }
 0x2fc   : > { %v2777_v11 = vpop.eup %2776 }
 0x2fd   : > { %v1296_v12 = vmul.f32 %v2777_v11, %v1295_v10 }
 0x2ff   : > { %v3549_v14 = vadd.f32 %v1297_v13, %v1296_v12 }
 0x301   : > { %v1299_v16 = vpack.c.bf16 %v3549_v14, %v3549_v14 }
 0x303   : > { %1301 = vst [vmem:[#allocation3 + $0x4] sm:$0xf] %v1299_v16  ;;  %1495 = vmatmul.mubr.bf16.vlgmr.msra.gmra.mrb[16].mxu0 %v1299_v16  ;;  %2496 = vmatmul.mubr.bf16.vlgmr.msra.gmra.mrb[12].mxu1 %v1299_v16 }
 0x304   : > { %1733 = vmatpush1.bf16.msra.mxu0 %v3392_v29  ;;  %1764 = vmatprep.mubr.bf16.mxu0 %v3089_v3  ;;  %v2740_v3 = vld [vmem:[#allocation11 + $0x8] ss:$12 sps:$4 sm:$0xff]   ;;  %v2741_v29 = vld [vmem:[#allocation11 + $0x20] ss:$12 sps:$4 sm:$0xff]  }
 0x305   : > { %1734 = vmatprep.subr.bf16.mxu0 %v3395_v30  ;;  %2515 = vmatprep.mubr.msk.bf16.mxu1 %vm3091_vm0, %v3090_v40  ;;  %v2742_v30 = vld [vmem:[#allocation11 + $0x38] ss:$12 sps:$4 sm:$0xff]  }
 0x306   : > { %2500 = vmatpush3.bf16.msra.mxu1 %v2740_v3 }
 0x307   : > { %2501 = vmatprep.subr.bf16.mxu1 %v3090_v40 }
 0x308   : > { %1735 = vmatpush1.bf16.msra.mxu0 %v3397_v32  ;;  %v2743_v32 = vld [vmem:[#allocation11 + $0x50] ss:$12 sps:$4 sm:$0xff]  }
 0x309   : > { %1736 = vmatprep.subr.bf16.mxu0 %v3403_v35  ;;  %v2744_v35 = vld [vmem:[#allocation11 + $0x68] ss:$12 sps:$4 sm:$0xff]  }
 0x30a   : > { %2502 = vmatpush3.bf16.msra.mxu1 %v2741_v29  ;;  %v2748_v56 = vld [vmem:[#allocation3] sm:$0xff]  }
 0x30b   : > { %2503 = vmatprep.subr.bf16.mxu1 %v3090_v40 }
 0x30c   : > { %1737 = vmatpush1.bf16.msra.mxu0 %v3405_v36  ;;  %v2745_v36 = vld [vmem:[#allocation11 + $0x80] ss:$12 sps:$4 sm:$0xff]  }
 0x30d   : > { %1738 = vmatprep.subr.bf16.mxu0 %v3408_v37  ;;  %v2746_v37 = vld [vmem:[#allocation11 + $0x98] ss:$12 sps:$4 sm:$0xff]  }
 0x30e   : > { %2504 = vmatpush3.bf16.msra.mxu1 %v2742_v30 }
 0x30f   : > { %2505 = vmatprep.subr.bf16.mxu1 %v3090_v40 }
 0x310   : > { %1739 = vmatpush1.bf16.msra.mxu0 %v3413_v41  ;;  %v2747_v41 = vld [vmem:[#allocation11 + $0xb0] ss:$12 sps:$4 sm:$0xff]  }
 0x311   : > { %1740 = vmatprep.subr.bf16.mxu0 %v3415_v43 }
 0x312   : > { %2506 = vmatpush3.bf16.msra.mxu1 %v2743_v32 }
 0x313   : > { %2507 = vmatprep.subr.bf16.mxu1 %v3090_v40 }
 0x314   : > { %1741 = vmatpush1.bf16.msra.mxu0 %v3420_v44 }
 0x315   : > { %1742 = vmatprep.subr.bf16.mxu0 %v3425_v46 }
 0x316   : > { %2508 = vmatpush3.bf16.msra.mxu1 %v2744_v35 }
 0x317   : > { %2509 = vmatprep.subr.bf16.mxu1 %v3090_v40 }
 0x318   : > { %1743 = vmatpush1.bf16.msra.mxu0 %v3430_v47 }
 0x319   : > { %1744 = vmatprep.subr.bf16.mxu0 %v3432_v49 }
 0x31a   : > { %2510 = vmatpush3.bf16.msra.mxu1 %v2745_v36 }
 0x31b   : > { %2511 = vmatprep.subr.bf16.mxu1 %v3090_v40 }
 0x31c   : > { %1745 = vmatpush1.bf16.msra.mxu0 %v3437_v50 }
 0x31d   : > { %1746 = vmatprep.subr.bf16.mxu0 %v3439_v52 }
 0x31e   : > { %2512 = vmatpush3.bf16.msra.mxu1 %v2746_v37 }
 0x31f   : > { %2513 = vmatprep.subr.bf16.mxu1 %v3090_v40 }
 0x320   : > { %1747 = vmatpush1.bf16.msra.mxu0 %v3444_v53 }
 0x321   : > { %2519 = vmatprep.subr.bf16.mxu0 %v2749_v57 }
 0x322   : > { %2514 = vmatpush3.bf16.msra.mxu1 %v2747_v41 }
 0x3d6   : > { %v1496_v43 = vpop.f32.mrb[16].mxu0  ;;  %v1537_v44 = vpop.f32.mrb[12].mxu1 }
 0x3d7   : > { %v1547_v46 = vadd.f32 %v1496_v43, %v3492_v21  ;;  %v1498_v47 = vpop.f32.mrb[17].mxu0  ;;  %v2497_v49 = vpop.f32.mrb[13].mxu1  ;;  %v1561_v24 = vadd.f32 %v3509_v6, %v1537_v44 }
 0x3d8   : > { %v1554_v50 = vadd.f32 %v1498_v47, %v3496_v25  ;;  %v1500_v52 = vpop.f32.mrb[18].mxu0  ;;  %v1540_v53 = vpop.f32.mrb[14].mxu1 }
 0x3d9   : > { %v2308_v42 = vmul.f32 -1.442695, %v1547_v46  ;;  %v1501_v19 = vpop.f32.mrb[19].mxu0  ;;  %v2498_v20 = vpop.f32.mrb[15].mxu1 }
 0x3da   : > { %v2309_v22 = vmul.f32 -1.442695, %v1554_v50 }
 0x3db   : > { %2778 = vpow2.f32 %v2308_v42 }
 0x3dc   : > { %2780 = vpow2.f32 %v2309_v22 }
 0x3e5   : > { %v2779_v26 = vpop.eup %2778 }
 0x3e6   : > { %v1551_v54 = vadd.f32 1.0, %v2779_v26  ;;  %v2781_v40 = vpop.eup %2780 }
 0x3e7   : > { %v1558_v18 = vadd.f32 1.0, %v2781_v40 }
 0x3e8   : > { %2782 = vrcp.f32 %v1551_v54 }
 0x3e9   : > { %2784 = vrcp.f32 %v1558_v18 }
 0x3f2   : > { %v2783_v21 = vpop.eup %2782 }
 0x3f3   : > { %v1562_v28 = vmul.f32 %v2783_v21, %v1561_v24  ;;  %v2785_v33 = vpop.eup %2784 }
 0x3f4   : > { %v1565_v38 = vsub.f32 1.0, %v2785_v33  ;;  %v1567_v48 = vmul.f32 %v2785_v33, %v3549_v14 }
 0x3f5   : > { %v1563_v25 = vadd.f32 %v1562_v28, %v3494_v23  ;;  %v2751_v23 = vld [vmem:[#allocation13 + $0x10] sm:$0xff]  }
 0x3f7   : > { %2786 = vtanh.f32 %v1563_v25 }
 0x401   : > { %v2787_v27 = vpop.eup %2786 }
 0x402   : > { %v1566_v45 = vmul.f32 %v2787_v27, %v1565_v38  ;;  %v2005_v38 = vld [vmem:[%s3370_s22 + $0x10] sm:$0xff]  ;;  %v2003_v27 = vld [vmem:[%s3370_s22] sm:$0xff] }
 0x404   : > { %v1568_v51 = vadd.f32 %v1567_v48, %v1566_v45  ;;  %v2006_v48 = vld [vmem:[%s3370_s22 + $0x18] sm:$0xff] }
 0x406   : > { %v1569_v55 = vpack.c.bf16 %v1568_v51, %v1568_v51 }
 0x408   : > { %1571 = vst [vmem:[#allocation3 + $0x8] sm:$0xf] %v1569_v55  ;;  %1765 = vmatmul.mubr.bf16.vlgmr.msra.gmra.mrb[20].mxu0 %v1569_v55  ;;  %2516 = vmatmul.mubr.bf16.vlgmr.msra.gmra.mrb[16].mxu1 %v1569_v55 }
 0x409   : > { %2535 = vmatprep.mubr.bf16.mxu0 %v2748_v56  ;;  %2520 = vmatpush3.bf16.msra.mxu0 %v2749_v57  ;;  %v2004_v56 = vld [vmem:[%s3370_s22 + $0x8] sm:$0xff] }
 0x40a   : > { %2521 = vmatprep.subr.bf16.mxu0 %v2750_v58 }
 0x40d   : > { %2522 = vmatpush3.bf16.msra.mxu0 %v2750_v58 }
 0x40e   : > { %2523 = vmatprep.subr.bf16.mxu0 %v2751_v23 }
 0x411   : > { %2524 = vmatpush3.bf16.msra.mxu0 %v2751_v23 }
 0x412   : > { %2525 = vmatprep.subr.bf16.mxu0 %v2752_v59 }
 0x415   : > { %2526 = vmatpush3.bf16.msra.mxu0 %v2752_v59 }
 0x416   : > { %2527 = vmatprep.subr.bf16.mxu0 %v2753_v60 }
 0x419   : > { %2528 = vmatpush3.bf16.msra.mxu0 %v2753_v60 }
 0x41a   : > { %2529 = vmatprep.subr.bf16.mxu0 %v2754_v61 }
 0x41d   : > { %2530 = vmatpush3.bf16.msra.mxu0 %v2754_v61 }
 0x41e   : > { %2531 = vmatprep.subr.bf16.mxu0 %v2755_v62 }
 0x421   : > { %2532 = vmatpush3.bf16.msra.mxu0 %v2755_v62 }
 0x422   : > { %2533 = vmatprep.subr.bf16.mxu0 %v2756_v63 }
 0x425   : > { %2534 = vmatpush3.bf16.msra.mxu0 %v2756_v63 }
 0x4db   : > { %v1766_v0 = vpop.f32.mrb[20].mxu0  ;;  %v1807_v1 = vpop.f32.mrb[16].mxu1 }
 0x4dc   : > { %v1817_v2 = vadd.f32 %v1766_v0, %v3498_v31  ;;  %v1768_v4 = vpop.f32.mrb[21].mxu0  ;;  %v2517_v5 = vpop.f32.mrb[17].mxu1  ;;  %v1831_v3 = vadd.f32 %v3509_v6, %v1807_v1  ;;  %v2336_v6 = vld [vmem:[%s3684_s7] ss:$0 sm:$0xff] }
 0x4dd   : > { %v1824_v7 = vadd.f32 %v1768_v4, %v3502_v39  ;;  %v1770_v15 = vpop.f32.mrb[22].mxu0  ;;  %v1810_v8 = vpop.f32.mrb[18].mxu1 }
 0x4de   : > { %v2334_v17 = vmul.f32 -1.442695, %v1817_v2  ;;  %v1771_v9 = vpop.f32.mrb[23].mxu0  ;;  %v2518_v10 = vpop.f32.mrb[19].mxu1 }
 0x4df   : > { %v2335_v11 = vmul.f32 -1.442695, %v1824_v7 }
 0x4e0   : > { %2788 = vpow2.f32 %v2334_v17 }
 0x4e1   : > { %2790 = vpow2.f32 %v2335_v11 }
 0x4ea   : > { %v2789_v12 = vpop.eup %2788 }
 0x4eb   : > { %v1821_v13 = vadd.f32 1.0, %v2789_v12  ;;  %v2791_v14 = vpop.eup %2790 }
 0x4ec   : > { %v1828_v16 = vadd.f32 1.0, %v2791_v14 }
 0x4ed   : > { %2792 = vrcp.f32 %v1821_v13 }
 0x4ee   : > { %2794 = vrcp.f32 %v1828_v16 }
 0x4f7   : > { %v2793_v31 = vpop.eup %2792 }
 0x4f8   : > { %v1832_v29 = vmul.f32 %v2793_v31, %v1831_v3  ;;  %v2795_v30 = vpop.eup %2794 }
 0x4f9   : > { %v1835_v32 = vsub.f32 1.0, %v2795_v30  ;;  %v1837_v37 = vmul.f32 %v2795_v30, %v1568_v51 }
 0x4fa   : > { %v1833_v39 = vadd.f32 %v1832_v29, %v3500_v34 }
 0x4fc   : > { %2796 = vtanh.f32 %v1833_v39 }
 0x506   : > { %v2797_v35 = vpop.eup %2796 }
 0x507   : > { %v1836_v36 = vmul.f32 %v2797_v35, %v1835_v32 }
 0x509   : > { %v1838_v41 = vadd.f32 %v1837_v37, %v1836_v36 }
 0x50b   : > { %v1839_v43 = vpack.c.bf16 %v1838_v41, %v1838_v41  ;;  %1842 = vst [vmem:[#allocation4] sm:$0xff] %v1838_v41  ;;  %2019 = vst [vmem:[#allocation15] sm:$0xff] (!%p2351_p1), %v1838_v41 }
 0x50d   : > { %1841 = vst [vmem:[#allocation3 + $0xc] sm:$0xf] %v1839_v43 }
 0x514   : > { %v2757_v44 = vld [vmem:[#allocation3 + $0x8] sm:$0xff]  }
 0x515   : > { %2536 = vmatmul.mubr.bf16.vlgmr.msra.gmra.mrb[24].mxu0 %v2757_v44 }
 0x5e8   : > { %v2537_v46 = vpop.f32.mrb[24].mxu0 }
 0x5e9   : > { %v1973_v47 = vadd.f32 %v2537_v46, %v2336_v6  ;;  %v1964_v49 = vpop.f32.mrb[25].mxu0 }
 0x5ea   : > { %v1965_v34 = vadd.f32 %v2336_v6, %v1964_v49  ;;  %v2538_v50 = vpop.f32.mrb[26].mxu0 }
 0x5eb   : > { %v2349_v52 = vmul.f32 -1.442695, %v1973_v47  ;;  %v1976_v53 = vadd.f32 %v2538_v50, %v2336_v6  ;;  %v1967_v42 = vpop.f32.mrb[27].mxu0 }
 0x5ec   : > { %v2347_v19 = vmul.f32 -1.442695, %v1965_v34  ;;  %v1968_v20 = vadd.f32 %v2336_v6, %v1967_v42 }
 0x5ed   : > { %2798 = vpow2.f32 %v2349_v52  ;;  %v2350_v22 = vmul.f32 -1.442695, %v1976_v53 }
 0x5ee   : > { %2800 = vpow2.f32 %v2347_v19  ;;  %v2348_v26 = vmul.f32 -1.442695, %v1968_v20 }
 0x5ef   : > { %2802 = vpow2.f32 %v2350_v22 }
 0x5f0   : > { %2804 = vpow2.f32 %v2348_v26 }
 0x5f7   : > { %v2799_v54 = vpop.eup %2798 }
 0x5f8   : > { %v2801_v40 = vpop.eup %2800  ;;  %v1993_v18 = vadd.f32 1.0, %v2799_v54 }
 0x5f9   : > { %v2803_v24 = vpop.eup %2802  ;;  %v1991_v21 = vadd.f32 1.0, %v2801_v40 }
 0x5fa   : > { %v2805_v28 = vpop.eup %2804  ;;  %2806 = vrcp.f32 %v1993_v18  ;;  %v1994_v25 = vadd.f32 1.0, %v2803_v24 }
 0x5fb   : > { %2808 = vrcp.f32 %v1991_v21  ;;  %v1992_v33 = vadd.f32 1.0, %v2805_v28 }
 0x5fc   : > { %2810 = vrcp.f32 %v1994_v25 }
 0x5fd   : > { %2812 = vrcp.f32 %v1992_v33 }
 0x604   : > { %v2807_v45 = vpop.eup %2806  ;;  %2018 = sbr.rel (%p2351_p1) target bundleno = 1547 (0x60b), region = 80 }
 0x605   : > { %v2809_v51 = vpop.eup %2808  ;;  %v2009_v55 = vmul.f32 %v2807_v45, %v2005_v38 }
 0x606   : > { %v2811_v57 = vpop.eup %2810  ;;  %v2007_v58 = vmul.f32 %v2809_v51, %v2003_v27 }
 0x607   : > { %v2813_v23 = vpop.eup %2812  ;;  %2013 = vst [vmem:[%s3384_s21 + $0x10] sm:$0xff] %v2009_v55  ;;  %v2010_v59 = vmul.f32 %v2811_v57, %v2006_v48 }
 0x608   : > { %2011 = vst [vmem:[%s3384_s21] sm:$0xff] %v2007_v58  ;;  %v2008_v60 = vmul.f32 %v2813_v23, %v2004_v56 }
 0x609   : > { %2014 = vst [vmem:[%s3384_s21 + $0x18] sm:$0xff] %v2010_v59 }
 0x60a   : > { %2012 = vst [vmem:[%s3384_s21 + $0x8] sm:$0xff] %v2008_v60 }
 0x60b PF: > { %s2362_s23 = sshll.u32 %s3068_s12, 9  ;;  %s3717_s8 = sld [smem:[#allocation26_spill]] }
 0x60c   : > { %s2035_s25 = sshll.u32 %s3384_s21, 4  ;;  %s2021_s29 = scalar_lea.sflag [#allocation7], %s3366_s16  ;;  %s3606_s25 = int_to_ptr.vmem [resolvable:$true] %s2035_s25 }
 0x60d   : > { %s2956_s22 = scalar_lea.vmem %s3606_s25, 512  ;;  %s3092_s17 = smov [#allocation14]  }
 0x60e   : > { %p2957_p2 = scmp.ne.s32.totalorder %s3606_s25, %s2956_s22  ;;  %s2960_s19 = sshll.u32 %s3092_s17, 4  ;;  %s2961_s19 = int_to_ptr.vmem [resolvable:$false] %s2960_s19 }
 0x60f   : > { %s2962_s12 = scalar_lea.vmem %s2961_s19, 1024  ;;  %p2963_p0 = scmp.lt.s32.totalorder %s3606_s25, %s2961_s19 }
 0x610   : > { %p2958_p4 = pnand %p2957_p2, %p3311_p6  ;;  %p2964_p5 = scmp.lt.s32.totalorder %s2962_s12, %s2956_s22 }
 0x611   : > { %s3603_s24 = scalar_lea.hbm %s3717_s8, %s2362_s23 }
 0x612   : > { %p2959_p8 = pneg %p2958_p4  ;;  %p2965_p10 = por %p2964_p5, %p2963_p0 }
 0x614   : > { %p2966_p13 = pnand %p2965_p10, %p2959_p8 }
 0x616   : > { %2969 = shalt.err (!%p2966_p13)
}
 0x617   : > { %s2970_s21 = scalar_lea.hbm %s3603_s24, 512  ;;  %s2974_s3 = scalar_lea.hbm %s3717_s8, 1024 }
 0x618   : > { %p2971_p9 = scmp.ne.s32.totalorder %s3603_s24, %s2970_s21  ;;  %p2975_p11 = scmp.lt.u32.totalorder %s3603_s24, %s3717_s8 }
 0x619   : > { %p2976_p12 = scmp.lt.u32.totalorder %s2974_s3, %s2970_s21  ;;  %p2978_p2 = scmp.lt.u32.totalorder %s2970_s21, %s3603_s24 }
 0x61a   : > { %p2972_p3 = pnand %p2971_p9, %p3311_p6 }
 0x61b   : > { %p2977_p1 = por %p2976_p12, %p2975_p11 }
 0x61c   : > { %p2973_p7 = pneg %p2972_p3 }
 0x61d   : > { %p2979_p4 = por %p2978_p2, %p2977_p1 }
 0x61f   : > { %p2980_p8 = pnand %p2979_p4, %p2973_p7 }
 0x621   : > { %2983 = shalt.err (!%p2980_p8)
}
 0x622   : > { %s3093_s28 = smov 128   ;;  %s3094_s15 = smov 8  }
 0x623   : > { %2557 = dma.vmem_to_hbm [thread:$0]  (%p3311_p6), %s3606_s25, 512, %s3603_s24, %s2021_s29, %s3093_s28, %s3093_s28, %s3094_s15  }
 0x624   : > { %s3095_s22 = smov [#allocation15]   ;;  %p3718_p5 = scmp.ne.s32.totalorder %s3702_s18, 0 }
 0x625   : > { %s2051_s17 = sshll.u32 %s3095_s22, 4  ;;  %s2052_s17 = int_to_ptr.vmem [resolvable:$true] %s2051_s17 }
 0x626   : > { %s2984_s19 = scalar_lea.vmem %s2052_s17, 128  ;;  %p2991_p9 = scmp.lt.s32.totalorder %s2052_s17, %s2052_s17 }
 0x627   : > { %p2985_p0 = scmp.ne.s32.totalorder %s2052_s17, %s2984_s19  ;;  %p2992_p3 = scmp.lt.s32.totalorder %s2984_s19, %s2984_s19 }
 0x629   : > { %p2986_p10 = pnand %p2985_p0, %p3718_p5  ;;  %p2993_p7 = por %p2992_p3, %p2991_p9 }
 0x62b   : > { %p2987_p13 = pneg %p2986_p10 }
 0x62d   : > { %p2994_p11 = pnand %p2993_p7, %p2987_p13 }
 0x62f   : > { %2997 = shalt.err (!%p2994_p11)
}
 0x630   : > { %s3719_s20 = sld [smem:[#allocation27_spill]] }
 0x636   : > { %s2998_s1 = scalar_lea.hbm %s3719_s20, 128 }
 0x637   : > { %p2999_p6 = scmp.ne.s32.totalorder %s3719_s20, %s2998_s1  ;;  %p3004_p2 = scmp.lt.u32.totalorder %s2998_s1, %s3719_s20 }
 0x639   : > { %p3000_p12 = pnand %p2999_p6, %p3718_p5 }
 0x63b   : > { %p3001_p1 = pneg %p3000_p12 }
 0x63d   : > { %p3006_p4 = pnand %p3004_p2, %p3001_p1 }
 0x63f   : > { %3009 = shalt.err (!%p3006_p4)
}
 0x640   : > { %2559 = dma.vmem_to_hbm [thread:$0]  (%p3718_p5), %s2052_s17, 128, %s3719_s20, [#allocation16]  }
 0x641   : > { %3047 = dma.done.wait (%p3718_p5), [#allocation16], 128  }
 0x642   : > { %3049 = vsyncadd (%p3718_p5), [#allocation16], 4294967168 }
 0x643 PF: > { %s3720_s30 = sld [smem:[#allocation22_spill]]  ;;  %s3721_s23 = sld [smem:[#allocation23_spill]] }
 0x644   : > { %p3723_p0 = scmp.ge.s32.totalorder %s3076_s14, 2 }
 0x649   : > { %s2067_s28 = sand.u32 1, %s3720_s30   ;;  %p3722_p8 = scmp.ne.s32.totalorder %s3721_s23, 0 }
 0x64a   : > { %s2068_s15 = scalar_lea.sflag [#allocation7], %s2067_s28 }
 0x64b   : > { %p2581_p10 = pnand %p3723_p0, %p3722_p8 }
 0x64d   : > { %3051 = dma.done.wait (!%p2581_p10), %s2068_s15, 512  }
 0x64e   : > { %3053 = vsyncadd (!%p2581_p10), %s2068_s15, 4294966784  ;;  %s29_s14 = sadd.s32 1, %s3076_s14   ;;  %s3724_s30 = smov %s3060_s10 }
 0x64f   : > { %p26_p13 = scmp.ge.s32.totalorder %s29_s14, 4   ;;  %s3725_s10 = smov %s3064_s11 }
 0x650   : > { %s3726_s11 = smov %s3320_s27  ;;  %s3727_s12 = smov %s3072_s13 }
 0x651   : > { %s3728_s13 = smov %s3730_s26  ;;  %28 = sbr.rel (!%p26_p13) target bundleno = 14 (0xe), region = 137 }
 0x658   :  { %2073 = vsyncpa [#allocation6], 1 }
 0x659   :  { %2075 = vsyncpa [#allocation6 + $0x1], 1 }
 0x65a   :  { %2076 = vsyncpa [#allocation9], 1 }
 0x65b   :  { %2077 = vsyncpa [#allocation12], 1 }
 0x65c   :  { %2078 = vsyncpa [#allocation7], 1 }
 0x65d   :  { %2080 = vsyncpa [#allocation7 + $0x1], 1 }
 0x65e   :  { %2081 = vsyncpa [#allocation16], 1 }

</bundles_post_ra>
